<compile_context>
chip_gen: v6e
topology: v6e:2x2x1
jax: 0.10.0
libtpu: 0.0.40
codegen_flags: <defaults>
</compile_context>

<pallas_src>
import functools

import jax
import jax.numpy as jnp
from jax.experimental import pallas as pl
from jax.experimental.pallas import tpu as pltpu

DIM_EMBEDDING = 100
LSTM_HIDDEN = 50

_LANE = 128      # lane width
_SUBLANE = 8     # sublane granularity


def _round_up(x, m):
    return ((x + m - 1) // m) * m


def _pad_to(x, shape):
    return jnp.pad(x, [(0, s - d) for d, s in zip(x.shape, shape)])


def tagger_kernel(ids_ref, emb_ref, w_ref, b_ref, out_ref, xs_ref, *, T, B, Bp, P):
    """Whole-sequence RNN tagger in a single kernel invocation.

    ids_ref: (B, T)       int32 word ids (scalar-prefetched into SMEM)
    emb_ref: (nwords, P)  zero-padded embedding table (VMEM)
    w_ref:   (3, P, P)    stacked [W_ih, W_hh, W_out], pre-transposed & zero-padded (VMEM)
    b_ref:   (2, P)       stacked [b_ih + b_hh, b_out], zero-padded (VMEM)
    out_ref: (Bp, T*P)    tag scores; time step t occupies lanes [t*P, (t+1)*P)
    xs_ref:  (T*Bp, P)    scratch: gathered, time-major embedded inputs
    """
    # Zero the gather scratch so padded batch rows stay exactly 0 (they are sliced off by
    # the wrapper; zeros keep everything finite and deterministic).
    xs_ref[...] = jnp.zeros_like(xs_ref)

    # In-kernel embedding gather (word_dropout = identity in eval mode).
    for t in range(T):                       # T, B static & tiny -> full unroll
        for b in range(B):
            r = t * Bp + b
            xs_ref[r:r + 1, :] = emb_ref[pl.ds(ids_ref[b, t], 1), :]

    w_ih = w_ref[0]
    w_hh = w_ref[1]
    w_out = w_ref[2]
    b_rnn = b_ref[0:1, :]
    b_out = b_ref[1:2, :]

    # Hoisted input projection: one MXU-filling matmul for all time steps at once
    # (biases pre-summed and folded in here).
    xp = jnp.dot(xs_ref[...], w_ih, preferred_element_type=jnp.float32) + b_rnn

    # Recurrence: only h @ W_hh + tanh sits on the serial chain; h stays in vregs.
    # The per-step output projection + store is off that chain and overlaps the tanh.
    h = jnp.zeros((Bp, P), jnp.float32)
    for t in range(T):
        x_t = xp[t * Bp:(t + 1) * Bp, :]     # static, sublane-aligned slice
        h = jnp.tanh(x_t + jnp.dot(h, w_hh, preferred_element_type=jnp.float32))
        scores = jnp.dot(h, w_out, preferred_element_type=jnp.float32) + b_out
        # Lane-aligned, unmasked (Bp, 128) store.
        out_ref[:, t * P:(t + 1) * P] = scores.astype(out_ref.dtype)


def prepare_params(params):
    """One-time padding / stacking of parameters (hoisted out of the per-call forward path).

    Returns (emb_p, w_stack, b_stack, ntags). Zero padding is exact: padded hidden units
    stay 0 through tanh and contribute nothing to the output.
    """
    emb, w_ih, w_hh, b_ih, b_hh, w_out, b_out = (
        params["emb"], params["w_ih"], params["w_hh"],
        params["b_ih"], params["b_hh"], params["w_out"], params["b_out"])
    D = emb.shape[1]
    H = w_hh.shape[0]
    ntags = w_out.shape[1]
    P = _round_up(max(D, H, ntags), _LANE)   # one lane-aligned feature dim for everything

    emb_p = _pad_to(emb, (emb.shape[0], P))
    w_stack = jnp.stack([_pad_to(w_ih, (P, P)),
                         _pad_to(w_hh, (P, P)),
                         _pad_to(w_out, (P, P))])           # (3, P, P) -> one DMA
    b_stack = jnp.concatenate([_pad_to(b_ih + b_hh, (1, P)),  # pre-summed recurrent biases
                               _pad_to(b_out, (1, P))], axis=0)  # (2, P) -> one DMA
    return emb_p, w_stack, b_stack, ntags


@functools.partial(jax.jit, static_argnames=("ntags",))
def tagger_forward(sentences, emb_p, w_stack, b_stack, *, ntags):
    """sentences: (B, T) int32 word ids. Returns (B, T, ntags) float32 scores."""
    B, T = sentences.shape
    P = emb_p.shape[1]
    Bp = _round_up(B, _SUBLANE)

    vmem = pl.BlockSpec(memory_space=pltpu.MemorySpace.VMEM)
    out_flat = pl.pallas_call(
        functools.partial(tagger_kernel, T=T, B=B, Bp=Bp, P=P),
        out_shape=jax.ShapeDtypeStruct((Bp, T * P), jnp.float32),
        grid_spec=pltpu.PrefetchScalarGridSpec(
            num_scalar_prefetch=1,               # sentence ids -> SMEM
            grid=(1,),                           # single invocation
            in_specs=[vmem, vmem, vmem],
            out_specs=vmem,
            scratch_shapes=[pltpu.VMEM((T * Bp, P), jnp.float32)]),
        compiler_params=pltpu.CompilerParams(dimension_semantics=("arbitrary",)),
    )(sentences.astype(jnp.int32), emb_p, w_stack, b_stack)

    # rnn_output_dropout: identity in eval mode; hidden_to_tag already fused in-kernel.
    # Reshape is free (contiguous); single slice drops batch/tag padding. Batch-first already.
    return out_flat.reshape(Bp, T, P)[:B, :, :ntags]


def _reference_forward(sentences, params):
    """Pure-JAX reference (lax.scan) for correctness checking."""
    emb, w_ih, w_hh, b_ih, b_hh, w_out, b_out = (
        params["emb"], params["w_ih"], params["w_hh"],
        params["b_ih"], params["b_hh"], params["w_out"], params["b_out"])
    x = jnp.take(emb, sentences, axis=0)                  # (B, T, D)
    B, T, D = x.shape
    H = w_hh.shape[0]

    def step(h, x_t):
        h_new = jnp.tanh(x_t @ w_ih + h @ w_hh + b_ih + b_hh)
        return h_new, h_new

    _, hs = jax.lax.scan(step, jnp.zeros((B, H), jnp.float32),
                         jnp.transpose(x, (1, 0, 2)))
    hs = jnp.transpose(hs, (1, 0, 2))                     # (B, T, H)
    return hs @ w_out + b_out


if __name__ == "__main__":
    nwords, ntags = 64, 10
    B, T = 2, 8
    D, H = DIM_EMBEDDING, LSTM_HIDDEN

    key = jax.random.PRNGKey(0)
    k_emb, k_ih, k_hh, k_bih, k_bhh, k_out, k_bout, k_sent = jax.random.split(key, 8)

    params = {
        # nn.Embedding(nwords, 100)
        "emb":   jax.random.normal(k_emb, (nwords, D), jnp.float32) * 0.1,
        # nn.RNN weights stored pre-transposed: (D, H), (H, H)
        "w_ih":  jax.random.normal(k_ih, (D, H), jnp.float32) * 0.1,
        "w_hh":  jax.random.normal(k_hh, (H, H), jnp.float32) * 0.1,
        "b_ih":  jax.random.normal(k_bih, (1, H), jnp.float32) * 0.1,
        "b_hh":  jax.random.normal(k_bhh, (1, H), jnp.float32) * 0.1,
        # nn.Linear(50, ntags) stored pre-transposed: (H, ntags)
        "w_out": jax.random.normal(k_out, (H, ntags), jnp.float32) * 0.1,
        "b_out": jax.random.normal(k_bout, (1, ntags), jnp.float32) * 0.1,
    }

    sentences = jax.random.randint(k_sent, (B, T), 0, nwords, dtype=jnp.int32)

    # One-time parameter prep (padding/stacking hoisted out of the forward path).
    emb_p, w_stack, b_stack, ntags_p = prepare_params(params)

    out = jax.block_until_ready(
        tagger_forward(sentences, emb_p, w_stack, b_stack, ntags=ntags_p))
    ref = jax.block_until_ready(_reference_forward(sentences, params))

    assert out.shape == (B, T, ntags), out.shape
    assert jnp.allclose(out, ref, atol=1e-5, rtol=1e-5), "mismatch vs reference"
    print("KERNEL_OK")
</pallas_src>

<mosaic_0001>
module attributes {stable_mosaic.version = 11 : i64} {
  func.func @tagger_kernel(%arg0: i32, %arg1: memref<2x8xi32, #tpu.memory_space<smem>>, %arg2: memref<64x128xf32, #tpu.memory_space<vmem>>, %arg3: memref<3x128x128xf32, #tpu.memory_space<vmem>>, %arg4: memref<2x128xf32, #tpu.memory_space<vmem>>, %arg5: memref<8x1024xf32, #tpu.memory_space<vmem>>, %arg6: memref<64x128xf32, #tpu.memory_space<vmem>>) attributes {dimension_semantics = [#tpu.dimension_semantics<arbitrary>], iteration_bounds = array<i64: 1>, scalar_prefetch = 1 : i64, scratch_operands = 1 : i64, tpu.core_type = #tpu.core_type<tc>, window_params = [{pipeline_mode = #tpu.pipeline_mode<synchronous>, transform_indices = @transform_0, window_bounds = array<i64: 64, 128>}, {pipeline_mode = #tpu.pipeline_mode<synchronous>, transform_indices = @transform_1, window_bounds = array<i64: 3, 128, 128>}, {pipeline_mode = #tpu.pipeline_mode<synchronous>, transform_indices = @transform_2, window_bounds = array<i64: 2, 128>}, {pipeline_mode = #tpu.pipeline_mode<synchronous>, transform_indices = @transform_3, window_bounds = array<i64: 8, 1024>}]} {
    %cst = arith.constant 0.000000e+00 : f32
    %0 = vector.broadcast %cst : f32 to vector<64x128xf32>
    %c0 = arith.constant 0 : index
    %c0_0 = arith.constant 0 : index
    %1 = vector.load %arg6[%c0, %c0_0] : memref<64x128xf32, #tpu.memory_space<vmem>>, vector<64x128xf32>
    tpu.vector_store %arg6[%c0, %c0_0], %0 {strides = array<i32>} : memref<64x128xf32, #tpu.memory_space<vmem>>, vector<64x128xf32>,
    %c0_1 = arith.constant 0 : index
    %c0_2 = arith.constant 0 : index
    %2 = memref.load %arg1[%c0_1, %c0_2] : memref<2x8xi32, #tpu.memory_space<smem>>
    %3 = arith.index_cast %2 : i32 to index
    %c0_3 = arith.constant 0 : index
    %4 = vector.load %arg2[%3, %c0_3] : memref<64x128xf32, #tpu.memory_space<vmem>>, vector<1x128xf32>
    %c0_4 = arith.constant 0 : index
    %c0_5 = arith.constant 0 : index
    %5 = vector.load %arg6[%c0_4, %c0_5] : memref<64x128xf32, #tpu.memory_space<vmem>>, vector<1x128xf32>
    tpu.vector_store %arg6[%c0_4, %c0_5], %4 {strides = array<i32>} : memref<64x128xf32, #tpu.memory_space<vmem>>, vector<1x128xf32>,
    %c1 = arith.constant 1 : index
    %c0_6 = arith.constant 0 : index
    %6 = memref.load %arg1[%c1, %c0_6] : memref<2x8xi32, #tpu.memory_space<smem>>
    %7 = arith.index_cast %6 : i32 to index
    %c0_7 = arith.constant 0 : index
    %8 = vector.load %arg2[%7, %c0_7] : memref<64x128xf32, #tpu.memory_space<vmem>>, vector<1x128xf32>
    %c1_8 = arith.constant 1 : index
    %c0_9 = arith.constant 0 : index
    %9 = vector.load %arg6[%c1_8, %c0_9] : memref<64x128xf32, #tpu.memory_space<vmem>>, vector<1x128xf32>
    tpu.vector_store %arg6[%c1_8, %c0_9], %8 {strides = array<i32>} : memref<64x128xf32, #tpu.memory_space<vmem>>, vector<1x128xf32>,
    %c0_10 = arith.constant 0 : index
    %c1_11 = arith.constant 1 : index
    %10 = memref.load %arg1[%c0_10, %c1_11] : memref<2x8xi32, #tpu.memory_space<smem>>
    %11 = arith.index_cast %10 : i32 to index
    %c0_12 = arith.constant 0 : index
    %12 = vector.load %arg2[%11, %c0_12] : memref<64x128xf32, #tpu.memory_space<vmem>>, vector<1x128xf32>
    %c8 = arith.constant 8 : index
    %c0_13 = arith.constant 0 : index
    %13 = vector.load %arg6[%c8, %c0_13] : memref<64x128xf32, #tpu.memory_space<vmem>>, vector<1x128xf32>
    tpu.vector_store %arg6[%c8, %c0_13], %12 {strides = array<i32>} : memref<64x128xf32, #tpu.memory_space<vmem>>, vector<1x128xf32>,
    %c1_14 = arith.constant 1 : index
    %c1_15 = arith.constant 1 : index
    %14 = memref.load %arg1[%c1_14, %c1_15] : memref<2x8xi32, #tpu.memory_space<smem>>
    %15 = arith.index_cast %14 : i32 to index
    %c0_16 = arith.constant 0 : index
    %16 = vector.load %arg2[%15, %c0_16] : memref<64x128xf32, #tpu.memory_space<vmem>>, vector<1x128xf32>
    %c9 = arith.constant 9 : index
    %c0_17 = arith.constant 0 : index
    %17 = vector.load %arg6[%c9, %c0_17] : memref<64x128xf32, #tpu.memory_space<vmem>>, vector<1x128xf32>
    tpu.vector_store %arg6[%c9, %c0_17], %16 {strides = array<i32>} : memref<64x128xf32, #tpu.memory_space<vmem>>, vector<1x128xf32>,
    %c0_18 = arith.constant 0 : index
    %c2 = arith.constant 2 : index
    %18 = memref.load %arg1[%c0_18, %c2] : memref<2x8xi32, #tpu.memory_space<smem>>
    %19 = arith.index_cast %18 : i32 to index
    %c0_19 = arith.constant 0 : index
    %20 = vector.load %arg2[%19, %c0_19] : memref<64x128xf32, #tpu.memory_space<vmem>>, vector<1x128xf32>
    %c16 = arith.constant 16 : index
    %c0_20 = arith.constant 0 : index
    %21 = vector.load %arg6[%c16, %c0_20] : memref<64x128xf32, #tpu.memory_space<vmem>>, vector<1x128xf32>
    tpu.vector_store %arg6[%c16, %c0_20], %20 {strides = array<i32>} : memref<64x128xf32, #tpu.memory_space<vmem>>, vector<1x128xf32>,
    %c1_21 = arith.constant 1 : index
    %c2_22 = arith.constant 2 : index
    %22 = memref.load %arg1[%c1_21, %c2_22] : memref<2x8xi32, #tpu.memory_space<smem>>
    %23 = arith.index_cast %22 : i32 to index
    %c0_23 = arith.constant 0 : index
    %24 = vector.load %arg2[%23, %c0_23] : memref<64x128xf32, #tpu.memory_space<vmem>>, vector<1x128xf32>
    %c17 = arith.constant 17 : index
    %c0_24 = arith.constant 0 : index
    %25 = vector.load %arg6[%c17, %c0_24] : memref<64x128xf32, #tpu.memory_space<vmem>>, vector<1x128xf32>
    tpu.vector_store %arg6[%c17, %c0_24], %24 {strides = array<i32>} : memref<64x128xf32, #tpu.memory_space<vmem>>, vector<1x128xf32>,
    %c0_25 = arith.constant 0 : index
    %c3 = arith.constant 3 : index
    %26 = memref.load %arg1[%c0_25, %c3] : memref<2x8xi32, #tpu.memory_space<smem>>
    %27 = arith.index_cast %26 : i32 to index
    %c0_26 = arith.constant 0 : index
    %28 = vector.load %arg2[%27, %c0_26] : memref<64x128xf32, #tpu.memory_space<vmem>>, vector<1x128xf32>
    %c24 = arith.constant 24 : index
    %c0_27 = arith.constant 0 : index
    %29 = vector.load %arg6[%c24, %c0_27] : memref<64x128xf32, #tpu.memory_space<vmem>>, vector<1x128xf32>
    tpu.vector_store %arg6[%c24, %c0_27], %28 {strides = array<i32>} : memref<64x128xf32, #tpu.memory_space<vmem>>, vector<1x128xf32>,
    %c1_28 = arith.constant 1 : index
    %c3_29 = arith.constant 3 : index
    %30 = memref.load %arg1[%c1_28, %c3_29] : memref<2x8xi32, #tpu.memory_space<smem>>
    %31 = arith.index_cast %30 : i32 to index
    %c0_30 = arith.constant 0 : index
    %32 = vector.load %arg2[%31, %c0_30] : memref<64x128xf32, #tpu.memory_space<vmem>>, vector<1x128xf32>
    %c25 = arith.constant 25 : index
    %c0_31 = arith.constant 0 : index
    %33 = vector.load %arg6[%c25, %c0_31] : memref<64x128xf32, #tpu.memory_space<vmem>>, vector<1x128xf32>
    tpu.vector_store %arg6[%c25, %c0_31], %32 {strides = array<i32>} : memref<64x128xf32, #tpu.memory_space<vmem>>, vector<1x128xf32>,
    %c0_32 = arith.constant 0 : index
    %c4 = arith.constant 4 : index
    %34 = memref.load %arg1[%c0_32, %c4] : memref<2x8xi32, #tpu.memory_space<smem>>
    %35 = arith.index_cast %34 : i32 to index
    %c0_33 = arith.constant 0 : index
    %36 = vector.load %arg2[%35, %c0_33] : memref<64x128xf32, #tpu.memory_space<vmem>>, vector<1x128xf32>
    %c32 = arith.constant 32 : index
    %c0_34 = arith.constant 0 : index
    %37 = vector.load %arg6[%c32, %c0_34] : memref<64x128xf32, #tpu.memory_space<vmem>>, vector<1x128xf32>
    tpu.vector_store %arg6[%c32, %c0_34], %36 {strides = array<i32>} : memref<64x128xf32, #tpu.memory_space<vmem>>, vector<1x128xf32>,
    %c1_35 = arith.constant 1 : index
    %c4_36 = arith.constant 4 : index
    %38 = memref.load %arg1[%c1_35, %c4_36] : memref<2x8xi32, #tpu.memory_space<smem>>
    %39 = arith.index_cast %38 : i32 to index
    %c0_37 = arith.constant 0 : index
    %40 = vector.load %arg2[%39, %c0_37] : memref<64x128xf32, #tpu.memory_space<vmem>>, vector<1x128xf32>
    %c33 = arith.constant 33 : index
    %c0_38 = arith.constant 0 : index
    %41 = vector.load %arg6[%c33, %c0_38] : memref<64x128xf32, #tpu.memory_space<vmem>>, vector<1x128xf32>
    tpu.vector_store %arg6[%c33, %c0_38], %40 {strides = array<i32>} : memref<64x128xf32, #tpu.memory_space<vmem>>, vector<1x128xf32>,
    %c0_39 = arith.constant 0 : index
    %c5 = arith.constant 5 : index
    %42 = memref.load %arg1[%c0_39, %c5] : memref<2x8xi32, #tpu.memory_space<smem>>
    %43 = arith.index_cast %42 : i32 to index
    %c0_40 = arith.constant 0 : index
    %44 = vector.load %arg2[%43, %c0_40] : memref<64x128xf32, #tpu.memory_space<vmem>>, vector<1x128xf32>
    %c40 = arith.constant 40 : index
    %c0_41 = arith.constant 0 : index
    %45 = vector.load %arg6[%c40, %c0_41] : memref<64x128xf32, #tpu.memory_space<vmem>>, vector<1x128xf32>
    tpu.vector_store %arg6[%c40, %c0_41], %44 {strides = array<i32>} : memref<64x128xf32, #tpu.memory_space<vmem>>, vector<1x128xf32>,
    %c1_42 = arith.constant 1 : index
    %c5_43 = arith.constant 5 : index
    %46 = memref.load %arg1[%c1_42, %c5_43] : memref<2x8xi32, #tpu.memory_space<smem>>
    %47 = arith.index_cast %46 : i32 to index
    %c0_44 = arith.constant 0 : index
    %48 = vector.load %arg2[%47, %c0_44] : memref<64x128xf32, #tpu.memory_space<vmem>>, vector<1x128xf32>
    %c41 = arith.constant 41 : index
    %c0_45 = arith.constant 0 : index
    %49 = vector.load %arg6[%c41, %c0_45] : memref<64x128xf32, #tpu.memory_space<vmem>>, vector<1x128xf32>
    tpu.vector_store %arg6[%c41, %c0_45], %48 {strides = array<i32>} : memref<64x128xf32, #tpu.memory_space<vmem>>, vector<1x128xf32>,
    %c0_46 = arith.constant 0 : index
    %c6 = arith.constant 6 : index
    %50 = memref.load %arg1[%c0_46, %c6] : memref<2x8xi32, #tpu.memory_space<smem>>
    %51 = arith.index_cast %50 : i32 to index
    %c0_47 = arith.constant 0 : index
    %52 = vector.load %arg2[%51, %c0_47] : memref<64x128xf32, #tpu.memory_space<vmem>>, vector<1x128xf32>
    %c48 = arith.constant 48 : index
    %c0_48 = arith.constant 0 : index
    %53 = vector.load %arg6[%c48, %c0_48] : memref<64x128xf32, #tpu.memory_space<vmem>>, vector<1x128xf32>
    tpu.vector_store %arg6[%c48, %c0_48], %52 {strides = array<i32>} : memref<64x128xf32, #tpu.memory_space<vmem>>, vector<1x128xf32>,
    %c1_49 = arith.constant 1 : index
    %c6_50 = arith.constant 6 : index
    %54 = memref.load %arg1[%c1_49, %c6_50] : memref<2x8xi32, #tpu.memory_space<smem>>
    %55 = arith.index_cast %54 : i32 to index
    %c0_51 = arith.constant 0 : index
    %56 = vector.load %arg2[%55, %c0_51] : memref<64x128xf32, #tpu.memory_space<vmem>>, vector<1x128xf32>
    %c49 = arith.constant 49 : index
    %c0_52 = arith.constant 0 : index
    %57 = vector.load %arg6[%c49, %c0_52] : memref<64x128xf32, #tpu.memory_space<vmem>>, vector<1x128xf32>
    tpu.vector_store %arg6[%c49, %c0_52], %56 {strides = array<i32>} : memref<64x128xf32, #tpu.memory_space<vmem>>, vector<1x128xf32>,
    %c0_53 = arith.constant 0 : index
    %c7 = arith.constant 7 : index
    %58 = memref.load %arg1[%c0_53, %c7] : memref<2x8xi32, #tpu.memory_space<smem>>
    %59 = arith.index_cast %58 : i32 to index
    %c0_54 = arith.constant 0 : index
    %60 = vector.load %arg2[%59, %c0_54] : memref<64x128xf32, #tpu.memory_space<vmem>>, vector<1x128xf32>
    %c56 = arith.constant 56 : index
    %c0_55 = arith.constant 0 : index
    %61 = vector.load %arg6[%c56, %c0_55] : memref<64x128xf32, #tpu.memory_space<vmem>>, vector<1x128xf32>
    tpu.vector_store %arg6[%c56, %c0_55], %60 {strides = array<i32>} : memref<64x128xf32, #tpu.memory_space<vmem>>, vector<1x128xf32>,
    %c1_56 = arith.constant 1 : index
    %c7_57 = arith.constant 7 : index
    %62 = memref.load %arg1[%c1_56, %c7_57] : memref<2x8xi32, #tpu.memory_space<smem>>
    %63 = arith.index_cast %62 : i32 to index
    %c0_58 = arith.constant 0 : index
    %64 = vector.load %arg2[%63, %c0_58] : memref<64x128xf32, #tpu.memory_space<vmem>>, vector<1x128xf32>
    %c57 = arith.constant 57 : index
    %c0_59 = arith.constant 0 : index
    %65 = vector.load %arg6[%c57, %c0_59] : memref<64x128xf32, #tpu.memory_space<vmem>>, vector<1x128xf32>
    tpu.vector_store %arg6[%c57, %c0_59], %64 {strides = array<i32>} : memref<64x128xf32, #tpu.memory_space<vmem>>, vector<1x128xf32>,
    %c0_60 = arith.constant 0 : index
    %c0_61 = arith.constant 0 : index
    %c0_62 = arith.constant 0 : index
    %66 = vector.load %arg3[%c0_60, %c0_61, %c0_62] : memref<3x128x128xf32, #tpu.memory_space<vmem>>, vector<1x128x128xf32>
    %67 = vector.shape_cast %66 : vector<1x128x128xf32> to vector<128x128xf32>
    %c1_63 = arith.constant 1 : index
    %c0_64 = arith.constant 0 : index
    %c0_65 = arith.constant 0 : index
    %68 = vector.load %arg3[%c1_63, %c0_64, %c0_65] : memref<3x128x128xf32, #tpu.memory_space<vmem>>, vector<1x128x128xf32>
    %69 = vector.shape_cast %68 : vector<1x128x128xf32> to vector<128x128xf32>
    %c2_66 = arith.constant 2 : index
    %c0_67 = arith.constant 0 : index
    %c0_68 = arith.constant 0 : index
    %70 = vector.load %arg3[%c2_66, %c0_67, %c0_68] : memref<3x128x128xf32, #tpu.memory_space<vmem>>, vector<1x128x128xf32>
    %71 = vector.shape_cast %70 : vector<1x128x128xf32> to vector<128x128xf32>
    %c0_69 = arith.constant 0 : index
    %c0_70 = arith.constant 0 : index
    %72 = vector.load %arg4[%c0_69, %c0_70] : memref<2x128xf32, #tpu.memory_space<vmem>>, vector<1x128xf32>
    %c1_71 = arith.constant 1 : index
    %c0_72 = arith.constant 0 : index
    %73 = vector.load %arg4[%c1_71, %c0_72] : memref<2x128xf32, #tpu.memory_space<vmem>>, vector<1x128xf32>
    %c0_73 = arith.constant 0 : index
    %c0_74 = arith.constant 0 : index
    %74 = vector.load %arg6[%c0_73, %c0_74] : memref<64x128xf32, #tpu.memory_space<vmem>>, vector<64x128xf32>
    %cst_75 = arith.constant dense<0.000000e+00> : vector<64x128xf32>
    %75 = tpu.matmul %74, %67, %cst_75 {dimension_numbers = #tpu.dot_dimension_numbers<[1], [0], [0], [1], [0, 0, 1, 1], [], []>} : vector<64x128xf32>, vector<128x128xf32>, vector<64x128xf32> -> vector<64x128xf32>
    %76 = vector.broadcast %72 : vector<1x128xf32> to vector<64x128xf32>
    %77 = arith.addf %75, %76 : vector<64x128xf32>
    %cst_76 = arith.constant 0.000000e+00 : f32
    %78 = vector.broadcast %cst_76 : f32 to vector<8x128xf32>
    %79 = vector.extract_strided_slice %77 {offsets = [0, 0], sizes = [8, 128], strides = [1, 1]} : vector<64x128xf32> to vector<8x128xf32>
    %cst_77 = arith.constant dense<0.000000e+00> : vector<8x128xf32>
    %80 = tpu.matmul %78, %69, %cst_77 {dimension_numbers = #tpu.dot_dimension_numbers<[1], [0], [0], [1], [0, 0, 1, 1], [], []>} : vector<8x128xf32>, vector<128x128xf32>, vector<8x128xf32> -> vector<8x128xf32>
    %81 = arith.addf %79, %80 : vector<8x128xf32>
    %82 = math.tanh %81 : vector<8x128xf32>
    %cst_78 = arith.constant dense<0.000000e+00> : vector<8x128xf32>
    %83 = tpu.matmul %82, %71, %cst_78 {dimension_numbers = #tpu.dot_dimension_numbers<[1], [0], [0], [1], [0, 0, 1, 1], [], []>} : vector<8x128xf32>, vector<128x128xf32>, vector<8x128xf32> -> vector<8x128xf32>
    %84 = vector.broadcast %73 : vector<1x128xf32> to vector<8x128xf32>
    %85 = arith.addf %83, %84 : vector<8x128xf32>
    %c0_79 = arith.constant 0 : index
    %c0_80 = arith.constant 0 : index
    %86 = vector.load %arg5[%c0_79, %c0_80] : memref<8x1024xf32, #tpu.memory_space<vmem>>, vector<8x128xf32>
    tpu.vector_store %arg5[%c0_79, %c0_80], %85 {strides = array<i32>} : memref<8x1024xf32, #tpu.memory_space<vmem>>, vector<8x128xf32>,
    %87 = vector.extract_strided_slice %77 {offsets = [8, 0], sizes = [8, 128], strides = [1, 1]} : vector<64x128xf32> to vector<8x128xf32>
    %cst_81 = arith.constant dense<0.000000e+00> : vector<8x128xf32>
    %88 = tpu.matmul %82, %69, %cst_81 {dimension_numbers = #tpu.dot_dimension_numbers<[1], [0], [0], [1], [0, 0, 1, 1], [], []>} : vector<8x128xf32>, vector<128x128xf32>, vector<8x128xf32> -> vector<8x128xf32>
    %89 = arith.addf %87, %88 : vector<8x128xf32>
    %90 = math.tanh %89 : vector<8x128xf32>
    %cst_82 = arith.constant dense<0.000000e+00> : vector<8x128xf32>
    %91 = tpu.matmul %90, %71, %cst_82 {dimension_numbers = #tpu.dot_dimension_numbers<[1], [0], [0], [1], [0, 0, 1, 1], [], []>} : vector<8x128xf32>, vector<128x128xf32>, vector<8x128xf32> -> vector<8x128xf32>
    %92 = vector.broadcast %73 : vector<1x128xf32> to vector<8x128xf32>
    %93 = arith.addf %91, %92 : vector<8x128xf32>
    %c0_83 = arith.constant 0 : index
    %c128 = arith.constant 128 : index
    %94 = vector.load %arg5[%c0_83, %c128] : memref<8x1024xf32, #tpu.memory_space<vmem>>, vector<8x128xf32>
    tpu.vector_store %arg5[%c0_83, %c128], %93 {strides = array<i32>} : memref<8x1024xf32, #tpu.memory_space<vmem>>, vector<8x128xf32>,
    %95 = vector.extract_strided_slice %77 {offsets = [16, 0], sizes = [8, 128], strides = [1, 1]} : vector<64x128xf32> to vector<8x128xf32>
    %cst_84 = arith.constant dense<0.000000e+00> : vector<8x128xf32>
    %96 = tpu.matmul %90, %69, %cst_84 {dimension_numbers = #tpu.dot_dimension_numbers<[1], [0], [0], [1], [0, 0, 1, 1], [], []>} : vector<8x128xf32>, vector<128x128xf32>, vector<8x128xf32> -> vector<8x128xf32>
    %97 = arith.addf %95, %96 : vector<8x128xf32>
    %98 = math.tanh %97 : vector<8x128xf32>
    %cst_85 = arith.constant dense<0.000000e+00> : vector<8x128xf32>
    %99 = tpu.matmul %98, %71, %cst_85 {dimension_numbers = #tpu.dot_dimension_numbers<[1], [0], [0], [1], [0, 0, 1, 1], [], []>} : vector<8x128xf32>, vector<128x128xf32>, vector<8x128xf32> -> vector<8x128xf32>
    %100 = vector.broadcast %73 : vector<1x128xf32> to vector<8x128xf32>
    %101 = arith.addf %99, %100 : vector<8x128xf32>
    %c0_86 = arith.constant 0 : index
    %c256 = arith.constant 256 : index
    %102 = vector.load %arg5[%c0_86, %c256] : memref<8x1024xf32, #tpu.memory_space<vmem>>, vector<8x128xf32>
    tpu.vector_store %arg5[%c0_86, %c256], %101 {strides = array<i32>} : memref<8x1024xf32, #tpu.memory_space<vmem>>, vector<8x128xf32>,
    %103 = vector.extract_strided_slice %77 {offsets = [24, 0], sizes = [8, 128], strides = [1, 1]} : vector<64x128xf32> to vector<8x128xf32>
    %cst_87 = arith.constant dense<0.000000e+00> : vector<8x128xf32>
    %104 = tpu.matmul %98, %69, %cst_87 {dimension_numbers = #tpu.dot_dimension_numbers<[1], [0], [0], [1], [0, 0, 1, 1], [], []>} : vector<8x128xf32>, vector<128x128xf32>, vector<8x128xf32> -> vector<8x128xf32>
    %105 = arith.addf %103, %104 : vector<8x128xf32>
    %106 = math.tanh %105 : vector<8x128xf32>
    %cst_88 = arith.constant dense<0.000000e+00> : vector<8x128xf32>
    %107 = tpu.matmul %106, %71, %cst_88 {dimension_numbers = #tpu.dot_dimension_numbers<[1], [0], [0], [1], [0, 0, 1, 1], [], []>} : vector<8x128xf32>, vector<128x128xf32>, vector<8x128xf32> -> vector<8x128xf32>
    %108 = vector.broadcast %73 : vector<1x128xf32> to vector<8x128xf32>
    %109 = arith.addf %107, %108 : vector<8x128xf32>
    %c0_89 = arith.constant 0 : index
    %c384 = arith.constant 384 : index
    %110 = vector.load %arg5[%c0_89, %c384] : memref<8x1024xf32, #tpu.memory_space<vmem>>, vector<8x128xf32>
    tpu.vector_store %arg5[%c0_89, %c384], %109 {strides = array<i32>} : memref<8x1024xf32, #tpu.memory_space<vmem>>, vector<8x128xf32>,
    %111 = vector.extract_strided_slice %77 {offsets = [32, 0], sizes = [8, 128], strides = [1, 1]} : vector<64x128xf32> to vector<8x128xf32>
    %cst_90 = arith.constant dense<0.000000e+00> : vector<8x128xf32>
    %112 = tpu.matmul %106, %69, %cst_90 {dimension_numbers = #tpu.dot_dimension_numbers<[1], [0], [0], [1], [0, 0, 1, 1], [], []>} : vector<8x128xf32>, vector<128x128xf32>, vector<8x128xf32> -> vector<8x128xf32>
    %113 = arith.addf %111, %112 : vector<8x128xf32>
    %114 = math.tanh %113 : vector<8x128xf32>
    %cst_91 = arith.constant dense<0.000000e+00> : vector<8x128xf32>
    %115 = tpu.matmul %114, %71, %cst_91 {dimension_numbers = #tpu.dot_dimension_numbers<[1], [0], [0], [1], [0, 0, 1, 1], [], []>} : vector<8x128xf32>, vector<128x128xf32>, vector<8x128xf32> -> vector<8x128xf32>
    %116 = vector.broadcast %73 : vector<1x128xf32> to vector<8x128xf32>
    %117 = arith.addf %115, %116 : vector<8x128xf32>
    %c0_92 = arith.constant 0 : index
    %c512 = arith.constant 512 : index
    %118 = vector.load %arg5[%c0_92, %c512] : memref<8x1024xf32, #tpu.memory_space<vmem>>, vector<8x128xf32>
    tpu.vector_store %arg5[%c0_92, %c512], %117 {strides = array<i32>} : memref<8x1024xf32, #tpu.memory_space<vmem>>, vector<8x128xf32>,
    %119 = vector.extract_strided_slice %77 {offsets = [40, 0], sizes = [8, 128], strides = [1, 1]} : vector<64x128xf32> to vector<8x128xf32>
    %cst_93 = arith.constant dense<0.000000e+00> : vector<8x128xf32>
    %120 = tpu.matmul %114, %69, %cst_93 {dimension_numbers = #tpu.dot_dimension_numbers<[1], [0], [0], [1], [0, 0, 1, 1], [], []>} : vector<8x128xf32>, vector<128x128xf32>, vector<8x128xf32> -> vector<8x128xf32>
    %121 = arith.addf %119, %120 : vector<8x128xf32>
    %122 = math.tanh %121 : vector<8x128xf32>
    %cst_94 = arith.constant dense<0.000000e+00> : vector<8x128xf32>
    %123 = tpu.matmul %122, %71, %cst_94 {dimension_numbers = #tpu.dot_dimension_numbers<[1], [0], [0], [1], [0, 0, 1, 1], [], []>} : vector<8x128xf32>, vector<128x128xf32>, vector<8x128xf32> -> vector<8x128xf32>
    %124 = vector.broadcast %73 : vector<1x128xf32> to vector<8x128xf32>
    %125 = arith.addf %123, %124 : vector<8x128xf32>
    %c0_95 = arith.constant 0 : index
    %c640 = arith.constant 640 : index
    %126 = vector.load %arg5[%c0_95, %c640] : memref<8x1024xf32, #tpu.memory_space<vmem>>, vector<8x128xf32>
    tpu.vector_store %arg5[%c0_95, %c640], %125 {strides = array<i32>} : memref<8x1024xf32, #tpu.memory_space<vmem>>, vector<8x128xf32>,
    %127 = vector.extract_strided_slice %77 {offsets = [48, 0], sizes = [8, 128], strides = [1, 1]} : vector<64x128xf32> to vector<8x128xf32>
    %cst_96 = arith.constant dense<0.000000e+00> : vector<8x128xf32>
    %128 = tpu.matmul %122, %69, %cst_96 {dimension_numbers = #tpu.dot_dimension_numbers<[1], [0], [0], [1], [0, 0, 1, 1], [], []>} : vector<8x128xf32>, vector<128x128xf32>, vector<8x128xf32> -> vector<8x128xf32>
    %129 = arith.addf %127, %128 : vector<8x128xf32>
    %130 = math.tanh %129 : vector<8x128xf32>
    %cst_97 = arith.constant dense<0.000000e+00> : vector<8x128xf32>
    %131 = tpu.matmul %130, %71, %cst_97 {dimension_numbers = #tpu.dot_dimension_numbers<[1], [0], [0], [1], [0, 0, 1, 1], [], []>} : vector<8x128xf32>, vector<128x128xf32>, vector<8x128xf32> -> vector<8x128xf32>
    %132 = vector.broadcast %73 : vector<1x128xf32> to vector<8x128xf32>
    %133 = arith.addf %131, %132 : vector<8x128xf32>
    %c0_98 = arith.constant 0 : index
    %c768 = arith.constant 768 : index
    %134 = vector.load %arg5[%c0_98, %c768] : memref<8x1024xf32, #tpu.memory_space<vmem>>, vector<8x128xf32>
    tpu.vector_store %arg5[%c0_98, %c768], %133 {strides = array<i32>} : memref<8x1024xf32, #tpu.memory_space<vmem>>, vector<8x128xf32>,
    %135 = vector.extract_strided_slice %77 {offsets = [56, 0], sizes = [8, 128], strides = [1, 1]} : vector<64x128xf32> to vector<8x128xf32>
    %cst_99 = arith.constant dense<0.000000e+00> : vector<8x128xf32>
    %136 = tpu.matmul %130, %69, %cst_99 {dimension_numbers = #tpu.dot_dimension_numbers<[1], [0], [0], [1], [0, 0, 1, 1], [], []>} : vector<8x128xf32>, vector<128x128xf32>, vector<8x128xf32> -> vector<8x128xf32>
    %137 = arith.addf %135, %136 : vector<8x128xf32>
    %138 = math.tanh %137 : vector<8x128xf32>
    %cst_100 = arith.constant dense<0.000000e+00> : vector<8x128xf32>
    %139 = tpu.matmul %138, %71, %cst_100 {dimension_numbers = #tpu.dot_dimension_numbers<[1], [0], [0], [1], [0, 0, 1, 1], [], []>} : vector<8x128xf32>, vector<128x128xf32>, vector<8x128xf32> -> vector<8x128xf32>
    %140 = vector.broadcast %73 : vector<1x128xf32> to vector<8x128xf32>
    %141 = arith.addf %139, %140 : vector<8x128xf32>
    %c0_101 = arith.constant 0 : index
    %c896 = arith.constant 896 : index
    %142 = vector.load %arg5[%c0_101, %c896] : memref<8x1024xf32, #tpu.memory_space<vmem>>, vector<8x128xf32>
    tpu.vector_store %arg5[%c0_101, %c896], %141 {strides = array<i32>} : memref<8x1024xf32, #tpu.memory_space<vmem>>, vector<8x128xf32>,
    return
  }
  func.func @transform_0(%arg0: i32, %arg1: memref<2x8xi32, #tpu.memory_space<smem>>) -> (i32, i32) {
    %c0_i32 = arith.constant 0 : i32
    %c0_i32_0 = arith.constant 0 : i32
    %c0_i32_1 = arith.constant 0 : i32
    return %c0_i32, %c0_i32_0 : i32, i32
  }
  func.func @transform_1(%arg0: i32, %arg1: memref<2x8xi32, #tpu.memory_space<smem>>) -> (i32, i32, i32) {
    %c0_i32 = arith.constant 0 : i32
    %c0_i32_0 = arith.constant 0 : i32
    %c0_i32_1 = arith.constant 0 : i32
    %c0_i32_2 = arith.constant 0 : i32
    return %c0_i32, %c0_i32_0, %c0_i32_1 : i32, i32, i32
  }
  func.func @transform_2(%arg0: i32, %arg1: memref<2x8xi32, #tpu.memory_space<smem>>) -> (i32, i32) {
    %c0_i32 = arith.constant 0 : i32
    %c0_i32_0 = arith.constant 0 : i32
    %c0_i32_1 = arith.constant 0 : i32
    return %c0_i32, %c0_i32_0 : i32, i32
  }
  func.func @transform_3(%arg0: i32, %arg1: memref<2x8xi32, #tpu.memory_space<smem>>) -> (i32, i32) {
    %c0_i32 = arith.constant 0 : i32
    %c0_i32_0 = arith.constant 0 : i32
    %c0_i32_1 = arith.constant 0 : i32
    return %c0_i32, %c0_i32_0 : i32, i32
  }
}

</mosaic_0001>

<bundles_post_ra>
// kernel: tagger_forward.1
= control target key start
LH: loop header
LB: loop body
LE: loop exit
PB: predicated region body
PF: predicated region fallthrough
CT: control target
= control target key end

     0   :  { %s2485_s15 = smov [#allocation4]   ;;  %s3283_s0 = inlined_call_operand.hbm [shape: s32[2,8], index: 0, kind: input, shape index: {}]   ;;  %s3284_s1 = inlined_call_operand.hbm [shape: f32[64,128], index: 1, kind: input, shape index: {}]   ;;  %s3285_s2 = inlined_call_operand.hbm [shape: f32[3,128,128], index: 2, kind: input, shape index: {}]   ;;  %s3286_s3 = inlined_call_operand.vmem [shape: f32[2,128], index: 3, kind: input, shape index: {}]   ;;  %s3287_s4 = inlined_call_operand.vmem [shape: f32[8,1024], index: 4, kind: output, shape index: {}]  }
   0x1   :  { %10 = dma.hbm_to_smem %s3283_s0, 32, %s2485_s15, [#allocation3] }
   0x2   :  { %2479 = dma.done.wait [#allocation3], 32 }
   0x3   :  { %2480 = vsyncadd [#allocation3], 4294967264 }
   0x4   :  { %12 = sfence }
   0x5   :  { %13 = vsyncpa [#allocation6], 0 }
   0x6   :  { %14 = vsyncpa [#allocation8], 0  ;;  %s2486_s18 = smov [#allocation5]  }
   0x7   :  { %s20_s19 = sshll.u32 %s2486_s18, 4  ;;  %s21_s19 = int_to_ptr.vmem [resolvable:$true] %s20_s19 }
   0x8   :  { %s2447_s20 = scalar_lea.vmem %s21_s19, 1024  ;;  %p2452_p1 = scmp.lt.s32.totalorder %s21_s19, %s21_s19 }
   0x9   :  { %p2448_p0 = scmp.ne.s32.totalorder %s21_s19, %s2447_s20  ;;  %p2453_p2 = scmp.lt.s32.totalorder %s2447_s20, %s2447_s20 }
   0xb   :  { %p2454_p3 = por %p2453_p2, %p2452_p1 }
   0xd   :  { %p2455_p4 = pnand %p2454_p3, %p2448_p0 }
   0xf   :  { %2458 = shalt.err (!%p2455_p4)
}
  0x10   :  { %s2487_s21 = smov 128   ;;  %s2488_s22 = smov 8  }
  0x11   :  { %26 = dma.hbm_to_vmem [thread:$0]  %s3284_s1, 1024, %s21_s19, [#allocation6], %s2487_s21, %s2487_s21, %s2488_s22  }
  0x12   :  { %s2489_s0 = smov [#allocation7]  }
  0x13   :  { %s32_s25 = sshll.u32 %s2489_s0, 4  ;;  %s33_s25 = int_to_ptr.vmem [resolvable:$true] %s32_s25 }
  0x14   :  { %s2467_s26 = scalar_lea.vmem %s33_s25, 6144  ;;  %p2472_p6 = scmp.lt.s32.totalorder %s33_s25, %s33_s25 }
  0x15   :  { %p2468_p5 = scmp.ne.s32.totalorder %s33_s25, %s2467_s26  ;;  %p2473_p7 = scmp.lt.s32.totalorder %s2467_s26, %s2467_s26 }
  0x17   :  { %p2474_p8 = por %p2473_p7, %p2472_p6 }
  0x19   :  { %p2475_p9 = pnand %p2474_p8, %p2468_p5 }
  0x1b   :  { %2478 = shalt.err (!%p2475_p9)
}
  0x1c   :  { %38 = dma.hbm_to_vmem [thread:$0]  %s3285_s2, 6144, %s33_s25, [#allocation8], %s2487_s21, %s2487_s21, %s2488_s22  }
  0x1d   :  { %2481 = dma.done.wait [#allocation6], 1024  }
  0x1e   :  { %2482 = vsyncadd [#allocation6], 4294966272 }
  0x1f   :  { %2483 = dma.done.wait [#allocation8], 6144  }
  0x20   :  { %2484 = vsyncadd [#allocation8], 4294961152  ;;  %v2490_v0 = vmov 0.0   ;;  %vm2491_vm0 = vmmov 0   ;;  %s2537_s1 = sld [smem:[#allocation4]]  ;;  %v134_v1 = vld [vmem:[#allocation7 + $0x78] sm:$0xff] }
  0x21   :  { %1815 = vmatprep.subr.mxu1 %v2490_v0  ;;  %47 = vst [vmem:[#allocation2] sm:$0xff] %v2490_v0  ;;  %48 = vst [vmem:[#allocation2 + $0x8] sm:$0xff] %v2490_v0  ;;  %1847 = vmatprep.mubr.msk.f32.mxu1 %vm2491_vm0, %v2490_v0  ;;  %s2539_s2 = sld [smem:[#allocation4 + $0x80]]  ;;  %v133_v2 = vld [vmem:[#allocation7 + $0x70] sm:$0xff]  ;;  %v2543_v3 = vld [vmem:[#allocation7 + $0xf8] sm:$0xff] }
  0x22   :  { %49 = vst [vmem:[#allocation2 + $0x10] sm:$0xff] %v2490_v0  ;;  %50 = vst [vmem:[#allocation2 + $0x18] sm:$0xff] %v2490_v0  ;;  %s2541_s29 = sld [smem:[#allocation4 + $0x1]]  ;;  %1771 = vmatprep.subr.mxu0 %v134_v1  ;;  %1816 = vmatpush3.msra.mxu1 %v2543_v3  ;;  %v2548_v4 = vld [vmem:[#allocation7 + $0xf0] sm:$0xff]  ;;  %v132_v5 = vld [vmem:[#allocation7 + $0x68] sm:$0xff] }
  0x23   :  { %51 = vst [vmem:[#allocation2 + $0x20] sm:$0xff] %v2490_v0  ;;  %52 = vst [vmem:[#allocation2 + $0x28] sm:$0xff] %v2490_v0  ;;  %s2545_s30 = sld [smem:[#allocation4 + $0x81]]  ;;  %1772 = vmatpush3.msra.mxu0 %v134_v1  ;;  %1817 = vmatprep.subr.mxu1 %v2490_v0  ;;  %v2551_v6 = vld [vmem:[#allocation7 + $0xe8] sm:$0xff]  ;;  %v131_v7 = vld [vmem:[#allocation7 + $0x60] sm:$0xff] }
  0x24   :  { %53 = vst [vmem:[#allocation2 + $0x30] sm:$0xff] %v2490_v0  ;;  %54 = vst [vmem:[#allocation2 + $0x38] sm:$0xff] %v2490_v0  ;;  %1773 = vmatprep.subr.mxu0 %v133_v2  ;;  %1818 = vmatpush3.msra.mxu1 %v2548_v4  ;;  %v2555_v8 = vld [vmem:[#allocation7 + $0xe0] sm:$0xff]  ;;  %v130_v9 = vld [vmem:[#allocation7 + $0x58] sm:$0xff]  ;;  %s1461_s9 = sld [smem:[#allocation4 + $0x2]] }
  0x25   :  { %1774 = vmatpush3.msra.mxu0 %v133_v2  ;;  %1819 = vmatprep.subr.mxu1 %v2490_v0  ;;  %v2559_v10 = vld [vmem:[#allocation7 + $0xd8] sm:$0xff]  ;;  %v129_v11 = vld [vmem:[#allocation7 + $0x50] sm:$0xff]  ;;  %v128_v13 = vld [vmem:[#allocation7 + $0x48] sm:$0xff]  ;;  %s1462_s10 = sld [smem:[#allocation4 + $0x82]] }
  0x26   :  { %1775 = vmatprep.subr.mxu0 %v132_v5  ;;  %1820 = vmatpush3.msra.mxu1 %v2551_v6  ;;  %v2563_v12 = vld [vmem:[#allocation7 + $0xd0] sm:$0xff]  ;;  %v2567_v14 = vld [vmem:[#allocation7 + $0xc8] sm:$0xff]  ;;  %s56_s5 = scalar_lea.vmem [#allocation5], %s2537_s1  ;;  %v127_v19 = vld [vmem:[#allocation7 + $0x40] sm:$0xff]  ;;  %s1463_s11 = sld [smem:[#allocation4 + $0x3]] }
  0x27   :  { %1776 = vmatpush3.msra.mxu0 %v132_v5  ;;  %1821 = vmatprep.subr.mxu1 %v2490_v0  ;;  %v57_v15 = vld [vmem:[%s56_s5] sm:$0x1]  ;;  %s60_s6 = scalar_lea.vmem [#allocation5], %s2539_s2  ;;  %v126_v21 = vld [vmem:[#allocation7 + $0x38] sm:$0xff]  ;;  %v125_v23 = vld [vmem:[#allocation7 + $0x30] sm:$0xff]  ;;  %s1464_s12 = sld [smem:[#allocation4 + $0x83]] }
  0x28   :  { %1777 = vmatprep.subr.mxu0 %v131_v7  ;;  %1822 = vmatpush3.msra.mxu1 %v2555_v8  ;;  %v61_v16 = vld [vmem:[%s60_s6] sm:$0x1]  ;;  %58 = vst [vmem:[#allocation2] sm:$0x1] %v57_v15  ;;  %s64_s7 = scalar_lea.vmem [#allocation5], %s2541_s29  ;;  %v2579_v22 = vld [vmem:[#allocation7 + $0xb8] sm:$0xff] }
  0x29   :  { %1778 = vmatpush3.msra.mxu0 %v131_v7  ;;  %1823 = vmatprep.subr.mxu1 %v2490_v0  ;;  %62 = vst [vmem:[#allocation2 + $0x1] sm:$0x1] %v61_v16  ;;  %v65_v17 = vld [vmem:[%s64_s7] sm:$0x1]  ;;  %s68_s8 = scalar_lea.vmem [#allocation5], %s2545_s30  ;;  %v2583_v24 = vld [vmem:[#allocation7 + $0xb0] sm:$0xff] }
  0x2a   :  { %1779 = vmatprep.subr.mxu0 %v130_v9  ;;  %1824 = vmatpush3.msra.mxu1 %v2559_v10  ;;  %v69_v18 = vld [vmem:[%s68_s8] sm:$0x1]  ;;  %66 = vst [vmem:[#allocation2 + $0x8] sm:$0x1] %v65_v17  ;;  %v124_v25 = vld [vmem:[#allocation7 + $0x28] sm:$0xff]  ;;  %v122_v29 = vld [vmem:[#allocation7 + $0x18] sm:$0xff] }
  0x2b   :  { %1780 = vmatpush3.msra.mxu0 %v130_v9  ;;  %1825 = vmatprep.subr.mxu1 %v2490_v0  ;;  %v2575_v20 = vld [vmem:[#allocation7 + $0xc0] sm:$0xff]  ;;  %70 = vst [vmem:[#allocation2 + $0x9] sm:$0x1] %v69_v18  ;;  %v2587_v26 = vld [vmem:[#allocation7 + $0xa8] sm:$0xff]  ;;  %v2595_v30 = vld [vmem:[#allocation7 + $0x98] sm:$0xff]  ;;  %s1465_s13 = sld [smem:[#allocation4 + $0x4]] }
  0x2c   :  { %1781 = vmatprep.subr.mxu0 %v129_v11  ;;  %1826 = vmatpush3.msra.mxu1 %v2563_v12  ;;  %v123_v27 = vld [vmem:[#allocation7 + $0x20] sm:$0xff]  ;;  %v121_v31 = vld [vmem:[#allocation7 + $0x10] sm:$0xff]  ;;  %v120_v33 = vld [vmem:[#allocation7 + $0x8] sm:$0xff]  ;;  %s2669_s14 = sld [smem:[#allocation4 + $0x84]]  ;;  %s72_s16 = scalar_lea.vmem [#allocation5], %s1461_s9 }
  0x2d   :  { %1782 = vmatpush3.msra.mxu0 %v129_v11  ;;  %1827 = vmatprep.subr.mxu1 %v2490_v0  ;;  %v2591_v28 = vld [vmem:[#allocation7 + $0xa0] sm:$0xff]  ;;  %v2599_v32 = vld [vmem:[#allocation7 + $0x90] sm:$0xff]  ;;  %v2604_v35 = vld [vmem:[#allocation7 + $0x88] sm:$0xff]  ;;  %s2671_s15 = sld [smem:[#allocation4 + $0x5]]  ;;  %s76_s18 = scalar_lea.vmem [#allocation5], %s1462_s10 }
  0x2e   :  { %1783 = vmatprep.subr.mxu0 %v128_v13  ;;  %1828 = vmatpush3.msra.mxu1 %v2567_v14  ;;  %v119_v36 = vld [vmem:[#allocation7] sm:$0xff]  ;;  %v2612_v39 = vld [vmem:[#allocation7 + $0x178] sm:$0xff]  ;;  %v2617_v40 = vld [vmem:[#allocation7 + $0x170] sm:$0xff]  ;;  %s2675_s17 = sld [smem:[#allocation4 + $0x85]]  ;;  %s80_s19 = scalar_lea.vmem [#allocation5], %s1463_s11 }
  0x2f   :  { %1784 = vmatpush3.msra.mxu0 %v128_v13  ;;  %1829 = vmatprep.subr.mxu1 %v2490_v0  ;;  %v2607_v37 = vld [vmem:[#allocation7 + $0x80] sm:$0xff]  ;;  %v2623_v41 = vld [vmem:[#allocation7 + $0x168] sm:$0xff]  ;;  %v2635_v43 = vld [vmem:[#allocation7 + $0x158] sm:$0xff]  ;;  %s2681_s20 = sld [smem:[#allocation4 + $0x6]]  ;;  %s84_s21 = scalar_lea.vmem [#allocation5], %s1464_s12 }
  0x30   :  { %1785 = vmatprep.subr.mxu0 %v127_v19  ;;  %1830 = vmatpush3.msra.mxu1 %v2575_v20  ;;  %v171_v34 = vld [vmem:[#allocation2] sm:$0xff]  ;;  %v2673_v44 = vld [vmem:[#allocation7 + $0x150] sm:$0xff]  ;;  %v2679_v47 = vld [vmem:[#allocation7 + $0x148] sm:$0xff]  ;;  %s2684_s22 = sld [smem:[#allocation4 + $0x86]] }
  0x31   :  { %1786 = vmatpush3.msra.mxu0 %v127_v19  ;;  %1831 = vmatprep.subr.mxu1 %v2490_v0  ;;  %v2629_v42 = vld [vmem:[#allocation7 + $0x160] sm:$0xff]  ;;  %s88_s23 = scalar_lea.vmem [#allocation5], %s1465_s13  ;;  %s2689_s24 = sld [smem:[#allocation4 + $0x7]]  ;;  %v2696_v53 = vld [vmem:[#allocation7 + $0x138] sm:$0xff]  ;;  %v2702_v56 = vld [vmem:[#allocation7 + $0x130] sm:$0xff] }
  0x32   :  { %1787 = vmatprep.subr.mxu0 %v126_v21  ;;  %1832 = vmatpush3.msra.mxu1 %v2579_v22  ;;  %v172_v38 = vld [vmem:[#allocation2 + $0x8] sm:$0xff]  ;;  %v73_v45 = vld [vmem:[%s72_s16] sm:$0x1]  ;;  %s92_s0 = scalar_lea.vmem [#allocation5], %s2669_s14  ;;  %s2693_s25 = sld [smem:[#allocation4 + $0x87]]  ;;  %v2715_v1 = vld [vmem:[#allocation7 + $0x118] sm:$0xff] }
  0x33   :  { %1788 = vmatpush3.msra.mxu0 %v126_v21  ;;  %1833 = vmatprep.subr.mxu1 %v2490_v0  ;;  %74 = vst [vmem:[#allocation2 + $0x10] sm:$0x1] %v73_v45  ;;  %v77_v46 = vld [vmem:[%s76_s18] sm:$0x1]  ;;  %s96_s26 = scalar_lea.vmem [#allocation5], %s2671_s15  ;;  %v2704_v57 = vld [vmem:[#allocation7 + $0x128] sm:$0xff] }
  0x34   :  { %1789 = vmatprep.subr.mxu0 %v125_v23  ;;  %1834 = vmatpush3.msra.mxu1 %v2583_v24  ;;  %78 = vst [vmem:[#allocation2 + $0x11] sm:$0x1] %v77_v46  ;;  %v81_v48 = vld [vmem:[%s80_s19] sm:$0x1]  ;;  %s100_s27 = scalar_lea.vmem [#allocation5], %s2675_s17  ;;  %v2720_v7 = vld [vmem:[#allocation7 + $0x110] sm:$0xff] }
  0x35   :  { %1790 = vmatpush3.msra.mxu0 %v125_v23  ;;  %1835 = vmatprep.subr.mxu1 %v2490_v0  ;;  %82 = vst [vmem:[#allocation2 + $0x18] sm:$0x1] %v81_v48  ;;  %v85_v49 = vld [vmem:[%s84_s21] sm:$0x1]  ;;  %s104_s28 = scalar_lea.vmem [#allocation5], %s2681_s20  ;;  %v2724_v11 = vld [vmem:[#allocation7 + $0x108] sm:$0xff] }
  0x36   :  { %1791 = vmatprep.subr.mxu0 %v124_v25  ;;  %1836 = vmatpush3.msra.mxu1 %v2587_v26  ;;  %v2687_v50 = vld [vmem:[#allocation7 + $0x140] sm:$0xff]  ;;  %86 = vst [vmem:[#allocation2 + $0x19] sm:$0x1] %v85_v49  ;;  %s108_s1 = scalar_lea.vmem [#allocation5], %s2684_s22 }
  0x37   :  { %1792 = vmatpush3.msra.mxu0 %v124_v25  ;;  %1837 = vmatprep.subr.mxu1 %v2490_v0  ;;  %v89_v51 = vld [vmem:[%s88_s23] sm:$0x1]  ;;  %s112_s2 = scalar_lea.vmem [#allocation5], %s2689_s24  ;;  %v2827_v46 = vld [vmem:[%s3286_s3 + $0x1] ss:$0 sm:$0xff] }
  0x38   :  { %1793 = vmatprep.subr.mxu0 %v123_v27  ;;  %1838 = vmatpush3.msra.mxu1 %v2591_v28  ;;  %90 = vst [vmem:[#allocation2 + $0x20] sm:$0x1] %v89_v51  ;;  %v93_v52 = vld [vmem:[%s92_s0] sm:$0x1]  ;;  %s116_s29 = scalar_lea.vmem [#allocation5], %s2693_s25 }
  0x39   :  { %1794 = vmatpush3.msra.mxu0 %v123_v27  ;;  %1839 = vmatprep.subr.mxu1 %v2490_v0  ;;  %94 = vst [vmem:[#allocation2 + $0x21] sm:$0x1] %v93_v52  ;;  %v97_v54 = vld [vmem:[%s96_s26] sm:$0x1] }
  0x3a   :  { %1795 = vmatprep.subr.mxu0 %v122_v29  ;;  %1840 = vmatpush3.msra.mxu1 %v2595_v30  ;;  %98 = vst [vmem:[#allocation2 + $0x28] sm:$0x1] %v97_v54  ;;  %v101_v55 = vld [vmem:[%s100_s27] sm:$0x1] }
  0x3b   :  { %1796 = vmatpush3.msra.mxu0 %v122_v29  ;;  %1841 = vmatprep.subr.mxu1 %v2490_v0  ;;  %102 = vst [vmem:[#allocation2 + $0x29] sm:$0x1] %v101_v55  ;;  %v173_v58 = vld [vmem:[#allocation2 + $0x10] sm:$0xff]  ;;  %v105_v59 = vld [vmem:[%s104_s28] sm:$0x1] }
  0x3c   :  { %1797 = vmatprep.subr.mxu0 %v121_v31  ;;  %1842 = vmatpush3.msra.mxu1 %v2599_v32  ;;  %v2709_v60 = vld [vmem:[#allocation7 + $0x120] sm:$0xff]  ;;  %106 = vst [vmem:[#allocation2 + $0x30] sm:$0x1] %v105_v59 }
  0x3d   :  { %1798 = vmatpush3.msra.mxu0 %v121_v31  ;;  %1843 = vmatprep.subr.mxu1 %v2490_v0  ;;  %v109_v61 = vld [vmem:[%s108_s1] sm:$0x1]  ;;  %v174_v62 = vld [vmem:[#allocation2 + $0x18] sm:$0xff] }
  0x3e   :  { %1799 = vmatprep.subr.mxu0 %v120_v33  ;;  %1803 = vmatprep.mubr.f32.mxu0 %v171_v34  ;;  %110 = vst [vmem:[#allocation2 + $0x31] sm:$0x1] %v109_v61  ;;  %v113_v63 = vld [vmem:[%s112_s2] sm:$0x1] }
  0x3f   :  { %1800 = vmatpush3.msra.mxu0 %v120_v33  ;;  %1844 = vmatpush3.msra.mxu1 %v2604_v35  ;;  %114 = vst [vmem:[#allocation2 + $0x38] sm:$0x1] %v113_v63  ;;  %v117_v2 = vld [vmem:[%s116_s29] sm:$0x1] }
  0x40   :  { %1801 = vmatprep.subr.mxu0 %v119_v36  ;;  %1845 = vmatprep.subr.mxu1 %v2490_v0  ;;  %v175_v5 = vld [vmem:[#allocation2 + $0x20] sm:$0xff]  ;;  %118 = vst [vmem:[#allocation2 + $0x39] sm:$0x1] %v117_v2 }
  0x41   :  { %1802 = vmatpush3.msra.mxu0 %v119_v36  ;;  %1846 = vmatpush3.msra.mxu1 %v2607_v37  ;;  %v2729_v15 = vld [vmem:[#allocation7 + $0x100] sm:$0xff] }
  0x42   :  { %1804 = vmatmul.mubr.f32.vlgmr.msra.gmra.mxu0 %v172_v38  ;;  %1848 = vmatmul.mubr.f32.vlgmr.msra.gmra.mxu1 %v2490_v0  ;;  %v176_v9 = vld [vmem:[#allocation2 + $0x28] sm:$0xff]  ;;  %v2741_v19 = vld [vmem:[%s3286_s3] ss:$0 sm:$0xff] }
  0x43   :  { %1850 = vmatprep.subr.mxu0 %v2490_v0  ;;  %1885 = vmatprep.subr.mxu1 %v2490_v0 }
  0x44   :  { %1851 = vmatpush3.msra.mxu0 %v2612_v39  ;;  %1886 = vmatpush3.msra.mxu1 %v2543_v3 }
  0x45   :  { %1852 = vmatprep.subr.mxu0 %v2490_v0  ;;  %1887 = vmatprep.subr.mxu1 %v2490_v0  ;;  %v177_v13 = vld [vmem:[#allocation2 + $0x30] sm:$0xff] }
  0x46   :  { %1853 = vmatpush3.msra.mxu0 %v2617_v40  ;;  %1888 = vmatpush3.msra.mxu1 %v2548_v4 }
  0x47   :  { %1854 = vmatprep.subr.mxu0 %v2490_v0  ;;  %1889 = vmatprep.subr.mxu1 %v2490_v0  ;;  %v178_v16 = vld [vmem:[#allocation2 + $0x38] sm:$0xff] }
  0x48   :  { %1855 = vmatpush3.msra.mxu0 %v2623_v41  ;;  %1890 = vmatpush3.msra.mxu1 %v2551_v6 }
  0x49   :  { %1856 = vmatprep.subr.mxu0 %v2490_v0  ;;  %1891 = vmatprep.subr.mxu1 %v2490_v0 }
  0x4a   :  { %1857 = vmatpush3.msra.mxu0 %v2629_v42  ;;  %1892 = vmatpush3.msra.mxu1 %v2555_v8 }
  0x4b   :  { %1858 = vmatprep.subr.mxu0 %v2490_v0  ;;  %1893 = vmatprep.subr.mxu1 %v2490_v0 }
  0x4c   :  { %1859 = vmatpush3.msra.mxu0 %v2635_v43  ;;  %1894 = vmatpush3.msra.mxu1 %v2559_v10 }
  0x4d   :  { %1860 = vmatprep.subr.mxu0 %v2490_v0  ;;  %1895 = vmatprep.subr.mxu1 %v2490_v0 }
  0x4e   :  { %1896 = vmatpush3.msra.mxu1 %v2563_v12  ;;  %1917 = vmatprep.mubr.msk.f32.mxu1 %vm2491_vm0, %v2490_v0 }
  0x4f   :  { %1897 = vmatprep.subr.mxu1 %v2490_v0  ;;  %1861 = vmatpush3.msra.mxu0 %v2673_v44 }
  0x50   :  { %1898 = vmatpush3.msra.mxu1 %v2567_v14  ;;  %1862 = vmatprep.subr.mxu0 %v2490_v0 }
  0x51   :  { %1899 = vmatprep.subr.mxu1 %v2490_v0  ;;  %1863 = vmatpush3.msra.mxu0 %v2679_v47 }
  0x52   :  { %1900 = vmatpush3.msra.mxu1 %v2575_v20  ;;  %1864 = vmatprep.subr.mxu0 %v2490_v0 }
  0x53   :  { %1901 = vmatprep.subr.mxu1 %v2490_v0  ;;  %1865 = vmatpush3.msra.mxu0 %v2687_v50 }
  0x54   :  { %1902 = vmatpush3.msra.mxu1 %v2579_v22  ;;  %1866 = vmatprep.subr.mxu0 %v2490_v0 }
  0x55   :  { %1903 = vmatprep.subr.mxu1 %v2490_v0  ;;  %1867 = vmatpush3.msra.mxu0 %v2696_v53 }
  0x56   :  { %1904 = vmatpush3.msra.mxu1 %v2583_v24  ;;  %1868 = vmatprep.subr.mxu0 %v2490_v0 }
  0x57   :  { %1905 = vmatprep.subr.mxu1 %v2490_v0  ;;  %1869 = vmatpush3.msra.mxu0 %v2702_v56 }
  0x58   :  { %1906 = vmatpush3.msra.mxu1 %v2587_v26  ;;  %1806 = vmatprep.mubr.f32.mxu0 %v173_v58 }
  0x59   :  { %1907 = vmatprep.subr.mxu1 %v2490_v0  ;;  %1870 = vmatprep.subr.mxu0 %v2490_v0 }
  0x5a   :  { %1908 = vmatpush3.msra.mxu1 %v2591_v28  ;;  %1871 = vmatpush3.msra.mxu0 %v2704_v57 }
  0x5b   :  { %1909 = vmatprep.subr.mxu1 %v2490_v0  ;;  %1807 = vmatmul.mubr.f32.gmra.mxu0 %v174_v62 }
  0x5c   :  { %1910 = vmatpush3.msra.mxu1 %v2595_v30  ;;  %1872 = vmatprep.subr.mxu0 %v2490_v0 }
  0x5d   :  { %1911 = vmatprep.subr.mxu1 %v2490_v0  ;;  %1873 = vmatpush3.msra.mxu0 %v2709_v60 }
  0x5e   :  { %1912 = vmatpush3.msra.mxu1 %v2599_v32  ;;  %1809 = vmatprep.mubr.f32.mxu0 %v175_v5 }
  0x5f   :  { %1913 = vmatprep.subr.mxu1 %v2490_v0  ;;  %1874 = vmatprep.subr.mxu0 %v2490_v0 }
  0x60   :  { %1914 = vmatpush3.msra.mxu1 %v2604_v35  ;;  %1875 = vmatpush3.msra.mxu0 %v2715_v1 }
  0x61   :  { %1915 = vmatprep.subr.mxu1 %v2490_v0  ;;  %1810 = vmatmul.mubr.f32.gmra.mxu0 %v176_v9 }
  0x62   :  { %1916 = vmatpush3.msra.mxu1 %v2607_v37  ;;  %1876 = vmatprep.subr.mxu0 %v2490_v0 }
  0x63   :  { %1955 = vmatprep.subr.mxu1 %v2490_v0  ;;  %1877 = vmatpush3.msra.mxu0 %v2720_v7 }
  0x64   :  { %1878 = vmatprep.subr.mxu0 %v2490_v0  ;;  %1812 = vmatprep.mubr.f32.mxu0 %v177_v13 }
  0x65   :  { %1879 = vmatpush3.msra.mxu0 %v2724_v11 }
  0x66   :  { %1880 = vmatprep.subr.mxu0 %v2490_v0  ;;  %1813 = vmatmul.mubr.f32.gmra.mxu0 %v178_v16 }
  0x67   :  { %1881 = vmatpush3.msra.mxu0 %v2729_v15  ;;  %1882 = vmatprep.mubr.msk.f32.mxu0 %vm2491_vm0, %v2490_v0 }
  0x68   :  { %1920 = vmatprep.subr.mxu0 %v2490_v0 }
 0x102   :  { %v2736_v17 = vpop.f32.mrf.mxu0  ;;  %v354_v18 = vpop.f32.mrf.mxu1 }
 0x103   :  { %v255_v48 = vadd.f32 %v2736_v17, %v2741_v19 }
 0x104   :  { %v249_v21 = vpop.f32.mrf.mxu0  ;;  %v1849_v23 = vpop.f32.mrf.mxu1 }
 0x105   :  { %v250_v25 = vadd.f32 %v2741_v19, %v249_v21 }
 0x107   :  { %v358_v27 = vadd.f32 %v354_v18, %v250_v25 }
 0x109   :  { %2382 = vtanh.f32 %v358_v27 }
 0x116   :  { %v2383_v29 = vpop.eup %2382 }
 0x117   :  { %1883 = vmatmul.mubr.f32.vlgmr.msra.gmra.mxu0 %v2383_v29  ;;  %1918 = vmatmul.mubr.f32.vlgmr.msra.gmra.mxu1 %v2383_v29 }
 0x118   :  { %1921 = vmatpush3.msra.mxu0 %v2612_v39  ;;  %1956 = vmatpush3.msra.mxu1 %v2543_v3 }
 0x119   :  { %1922 = vmatprep.subr.mxu0 %v2490_v0  ;;  %1957 = vmatprep.subr.mxu1 %v2490_v0 }
 0x11a   :  { %1923 = vmatpush3.msra.mxu0 %v2617_v40  ;;  %1958 = vmatpush3.msra.mxu1 %v2548_v4 }
 0x11b   :  { %1924 = vmatprep.subr.mxu0 %v2490_v0  ;;  %1959 = vmatprep.subr.mxu1 %v2490_v0  ;;  %v2812_v31 = vpop.f32.mrf.mxu0 }
 0x11c   :  { %1925 = vmatpush3.msra.mxu0 %v2623_v41  ;;  %1960 = vmatpush3.msra.mxu1 %v2551_v6  ;;  %v265_v17 = vadd.f32 %v2812_v31, %v2741_v19  ;;  %v3142_v31 = vld [vmem:[#allocation7 + $0x88] sm:$0xff] }
 0x11d   :  { %1926 = vmatprep.subr.mxu0 %v2490_v0  ;;  %1961 = vmatprep.subr.mxu1 %v2490_v0  ;;  %v2814_v33 = vpop.f32.mrf.mxu0 }
 0x11e   :  { %1927 = vmatpush3.msra.mxu0 %v2629_v42  ;;  %1962 = vmatpush3.msra.mxu1 %v2555_v8  ;;  %v260_v61 = vadd.f32 %v2741_v19, %v2814_v33 }
 0x11f   :  { %1928 = vmatprep.subr.mxu0 %v2490_v0  ;;  %1963 = vmatprep.subr.mxu1 %v2490_v0 }
 0x120   :  { %1929 = vmatpush3.msra.mxu0 %v2635_v43  ;;  %1964 = vmatpush3.msra.mxu1 %v2559_v10 }
 0x121   :  { %1930 = vmatprep.subr.mxu0 %v2490_v0  ;;  %1965 = vmatprep.subr.mxu1 %v2490_v0  ;;  %v2816_v34 = vpop.f32.mrf.mxu0 }
 0x122   :  { %1931 = vmatpush3.msra.mxu0 %v2673_v44  ;;  %1966 = vmatpush3.msra.mxu1 %v2563_v12 }
 0x123   :  { %1932 = vmatprep.subr.mxu0 %v2490_v0  ;;  %1967 = vmatprep.subr.mxu1 %v2490_v0  ;;  %v2818_v36 = vpop.f32.mrf.mxu0 }
 0x124   :  { %1933 = vmatpush3.msra.mxu0 %v2679_v47  ;;  %1968 = vmatpush3.msra.mxu1 %v2567_v14 }
 0x125   :  { %1934 = vmatprep.subr.mxu0 %v2490_v0  ;;  %1969 = vmatprep.subr.mxu1 %v2490_v0 }
 0x126   :  { %1935 = vmatpush3.msra.mxu0 %v2687_v50  ;;  %1970 = vmatpush3.msra.mxu1 %v2575_v20  ;;  %v2820_v38 = vpop.f32.mrf.mxu0 }
 0x127   :  { %1936 = vmatprep.subr.mxu0 %v2490_v0  ;;  %1971 = vmatprep.subr.mxu1 %v2490_v0 }
 0x128   :  { %1937 = vmatpush3.msra.mxu0 %v2696_v53  ;;  %1972 = vmatpush3.msra.mxu1 %v2579_v22  ;;  %v2822_v45 = vpop.f32.mrf.mxu0 }
 0x129   :  { %1938 = vmatprep.subr.mxu0 %v2490_v0  ;;  %1973 = vmatprep.subr.mxu1 %v2490_v0 }
 0x12a   :  { %1939 = vmatpush3.msra.mxu0 %v2702_v56  ;;  %1974 = vmatpush3.msra.mxu1 %v2583_v24 }
 0x12b   :  { %1940 = vmatprep.subr.mxu0 %v2490_v0  ;;  %1975 = vmatprep.subr.mxu1 %v2490_v0 }
 0x12c   :  { %1941 = vmatpush3.msra.mxu0 %v2704_v57  ;;  %1976 = vmatpush3.msra.mxu1 %v2587_v26 }
 0x12d   :  { %1942 = vmatprep.subr.mxu0 %v2490_v0  ;;  %1977 = vmatprep.subr.mxu1 %v2490_v0 }
 0x12e   :  { %1943 = vmatpush3.msra.mxu0 %v2709_v60  ;;  %1978 = vmatpush3.msra.mxu1 %v2591_v28 }
 0x12f   :  { %1944 = vmatprep.subr.mxu0 %v2490_v0  ;;  %1979 = vmatprep.subr.mxu1 %v2490_v0 }
 0x130   :  { %1945 = vmatpush3.msra.mxu0 %v2715_v1  ;;  %1980 = vmatpush3.msra.mxu1 %v2595_v30 }
 0x131   :  { %1946 = vmatprep.subr.mxu0 %v2490_v0  ;;  %1981 = vmatprep.subr.mxu1 %v2490_v0 }
 0x132   :  { %1947 = vmatpush3.msra.mxu0 %v2720_v7  ;;  %1982 = vmatpush3.msra.mxu1 %v2599_v32 }
 0x133   :  { %1948 = vmatprep.subr.mxu0 %v2490_v0  ;;  %1983 = vmatprep.subr.mxu1 %v2490_v0 }
 0x134   :  { %1949 = vmatpush3.msra.mxu0 %v2724_v11  ;;  %1984 = vmatpush3.msra.mxu1 %v2604_v35 }
 0x135   :  { %1950 = vmatprep.subr.mxu0 %v2490_v0  ;;  %1985 = vmatprep.subr.mxu1 %v2490_v0 }
 0x136   :  { %1951 = vmatpush3.msra.mxu0 %v2729_v15  ;;  %1952 = vmatprep.mubr.msk.f32.mxu0 %vm2491_vm0, %v2490_v0 }
 0x137   :  { %1986 = vmatpush3.msra.mxu1 %v2607_v37  ;;  %1987 = vmatprep.mubr.msk.f32.mxu1 %vm2491_vm0, %v2490_v0 }
 0x138   :  { %1990 = vmatprep.subr.mxu0 %v2490_v0  ;;  %2025 = vmatprep.subr.mxu1 %v2490_v0 }
 0x1d7   :  { %v430_v49 = vpop.f32.mrf.mxu0  ;;  %v501_v51 = vpop.f32.mrf.mxu1 }
 0x1d8   :  { %v431_v52 = vadd.f32 %v2827_v46, %v430_v49  ;;  %v505_v54 = vadd.f32 %v501_v51, %v255_v48  ;;  %v275_v48 = vadd.f32 %v2816_v34, %v2741_v19  ;;  %v3169_v34 = vld [vmem:[#allocation7 + $0x170] sm:$0xff] }
 0x1d9   :  { %v1884_v55 = vpop.f32.mrf.mxu0  ;;  %v1919_v58 = vpop.f32.mrf.mxu1 }
 0x1da   :  { %434 = vst [vmem:[%s3287_s4] sm:$0xff] %v431_v52  ;;  %2384 = vtanh.f32 %v505_v54 }
 0x1e7   :  { %v2385_v59 = vpop.eup %2384 }
 0x1e8   :  { %1953 = vmatmul.mubr.f32.vlgmr.msra.gmra.mxu0 %v2385_v59  ;;  %1988 = vmatmul.mubr.f32.vlgmr.msra.gmra.mxu1 %v2385_v59 }
 0x1e9   :  { %1991 = vmatpush3.msra.mxu0 %v2612_v39  ;;  %2026 = vmatpush3.msra.mxu1 %v2543_v3 }
 0x1ea   :  { %1992 = vmatprep.subr.mxu0 %v2490_v0  ;;  %2027 = vmatprep.subr.mxu1 %v2490_v0 }
 0x1eb   :  { %1993 = vmatpush3.msra.mxu0 %v2617_v40  ;;  %2028 = vmatpush3.msra.mxu1 %v2548_v4 }
 0x1ec   :  { %1994 = vmatprep.subr.mxu0 %v2490_v0  ;;  %2029 = vmatprep.subr.mxu1 %v2490_v0 }
 0x1ed   :  { %1995 = vmatpush3.msra.mxu0 %v2623_v41  ;;  %2030 = vmatpush3.msra.mxu1 %v2551_v6 }
 0x1ee   :  { %1996 = vmatprep.subr.mxu0 %v2490_v0  ;;  %2031 = vmatprep.subr.mxu1 %v2490_v0 }
 0x1ef   :  { %1997 = vmatpush3.msra.mxu0 %v2629_v42  ;;  %2032 = vmatpush3.msra.mxu1 %v2555_v8 }
 0x1f0   :  { %1998 = vmatprep.subr.mxu0 %v2490_v0  ;;  %2033 = vmatprep.subr.mxu1 %v2490_v0 }
 0x1f1   :  { %1999 = vmatpush3.msra.mxu0 %v2635_v43  ;;  %2034 = vmatpush3.msra.mxu1 %v2559_v10 }
 0x1f2   :  { %2000 = vmatprep.subr.mxu0 %v2490_v0  ;;  %2035 = vmatprep.subr.mxu1 %v2490_v0 }
 0x1f3   :  { %2001 = vmatpush3.msra.mxu0 %v2673_v44  ;;  %2036 = vmatpush3.msra.mxu1 %v2563_v12 }
 0x1f4   :  { %2002 = vmatprep.subr.mxu0 %v2490_v0  ;;  %2037 = vmatprep.subr.mxu1 %v2490_v0 }
 0x1f5   :  { %2003 = vmatpush3.msra.mxu0 %v2679_v47  ;;  %2038 = vmatpush3.msra.mxu1 %v2567_v14 }
 0x1f6   :  { %2004 = vmatprep.subr.mxu0 %v2490_v0  ;;  %2039 = vmatprep.subr.mxu1 %v2490_v0 }
 0x1f7   :  { %2005 = vmatpush3.msra.mxu0 %v2687_v50  ;;  %2040 = vmatpush3.msra.mxu1 %v2575_v20 }
 0x1f8   :  { %2006 = vmatprep.subr.mxu0 %v2490_v0  ;;  %2041 = vmatprep.subr.mxu1 %v2490_v0 }
 0x1f9   :  { %2007 = vmatpush3.msra.mxu0 %v2696_v53  ;;  %2042 = vmatpush3.msra.mxu1 %v2579_v22 }
 0x1fa   :  { %2008 = vmatprep.subr.mxu0 %v2490_v0  ;;  %2043 = vmatprep.subr.mxu1 %v2490_v0 }
 0x1fb   :  { %2009 = vmatpush3.msra.mxu0 %v2702_v56  ;;  %2044 = vmatpush3.msra.mxu1 %v2583_v24 }
 0x1fc   :  { %2010 = vmatprep.subr.mxu0 %v2490_v0  ;;  %2045 = vmatprep.subr.mxu1 %v2490_v0 }
 0x1fd   :  { %2011 = vmatpush3.msra.mxu0 %v2704_v57  ;;  %2046 = vmatpush3.msra.mxu1 %v2587_v26 }
 0x1fe   :  { %2012 = vmatprep.subr.mxu0 %v2490_v0  ;;  %2047 = vmatprep.subr.mxu1 %v2490_v0 }
 0x1ff   :  { %2013 = vmatpush3.msra.mxu0 %v2709_v60  ;;  %2048 = vmatpush3.msra.mxu1 %v2591_v28 }
 0x200   :  { %2014 = vmatprep.subr.mxu0 %v2490_v0  ;;  %2049 = vmatprep.subr.mxu1 %v2490_v0 }
 0x201   :  { %2015 = vmatpush3.msra.mxu0 %v2715_v1  ;;  %2050 = vmatpush3.msra.mxu1 %v2595_v30 }
 0x202   :  { %2016 = vmatprep.subr.mxu0 %v2490_v0  ;;  %2051 = vmatprep.subr.mxu1 %v2490_v0 }
 0x203   :  { %2017 = vmatpush3.msra.mxu0 %v2720_v7  ;;  %2052 = vmatpush3.msra.mxu1 %v2599_v32 }
 0x204   :  { %2018 = vmatprep.subr.mxu0 %v2490_v0  ;;  %2053 = vmatprep.subr.mxu1 %v2490_v0 }
 0x205   :  { %2019 = vmatpush3.msra.mxu0 %v2724_v11  ;;  %2054 = vmatpush3.msra.mxu1 %v2604_v35 }
 0x206   :  { %2020 = vmatprep.subr.mxu0 %v2490_v0  ;;  %2055 = vmatprep.subr.mxu1 %v2490_v0 }
 0x207   :  { %2021 = vmatpush3.msra.mxu0 %v2729_v15  ;;  %2022 = vmatprep.mubr.msk.f32.mxu0 %vm2491_vm0, %v2490_v0 }
 0x208   :  { %2056 = vmatpush3.msra.mxu1 %v2607_v37  ;;  %2057 = vmatprep.mubr.msk.f32.mxu1 %vm2491_vm0, %v2490_v0 }
 0x209   :  { %2060 = vmatprep.subr.mxu0 %v2490_v0  ;;  %2095 = vmatprep.subr.mxu1 %v2490_v0 }
 0x2a8   :  { %v573_v62 = vpop.f32.mrf.mxu0  ;;  %v644_v63 = vpop.f32.mrf.mxu1 }
 0x2a9   :  { %v574_v2 = vadd.f32 %v2827_v46, %v573_v62  ;;  %v648_v5 = vadd.f32 %v644_v63, %v260_v61  ;;  %v3163_v61 = vld [vmem:[#allocation7 + $0x178] sm:$0xff]  ;;  %v3175_v62 = vld [vmem:[#allocation7 + $0x168] sm:$0xff]  ;;  %v3181_v63 = vld [vmem:[#allocation7 + $0x160] sm:$0xff] }
 0x2aa   :  { %v1954_v9 = vpop.f32.mrf.mxu0  ;;  %v1989_v13 = vpop.f32.mrf.mxu1 }
 0x2ab   :  { %577 = vst [vmem:[%s3287_s4 + $0x8] sm:$0xff] %v574_v2  ;;  %2386 = vtanh.f32 %v648_v5  ;;  %v3187_v2 = vld [vmem:[#allocation7 + $0x158] sm:$0xff]  ;;  %v3193_v5 = vld [vmem:[#allocation7 + $0x150] sm:$0xff]  ;;  %v2424_v9 = vld [vmem:[#allocation7 + $0x128] sm:$0xff] }
 0x2ac   :  { %v2425_v13 = vld [vmem:[#allocation7 + $0x120] sm:$0xff] }
 0x2b8   :  { %v2387_v16 = vpop.eup %2386 }
 0x2b9   :  { %2023 = vmatmul.mubr.f32.vlgmr.msra.gmra.mxu0 %v2387_v16  ;;  %2058 = vmatmul.mubr.f32.vlgmr.msra.gmra.mxu1 %v2387_v16  ;;  %v2426_v16 = vld [vmem:[#allocation7 + $0x118] sm:$0xff] }
 0x2ba   :  { %2061 = vmatpush3.msra.mxu0 %v2612_v39  ;;  %2096 = vmatpush3.msra.mxu1 %v2543_v3 }
 0x2bb   :  { %2062 = vmatprep.subr.mxu0 %v2490_v0  ;;  %2097 = vmatprep.subr.mxu1 %v2490_v0 }
 0x2bc   :  { %2063 = vmatpush3.msra.mxu0 %v2617_v40  ;;  %2098 = vmatpush3.msra.mxu1 %v2548_v4 }
 0x2bd   :  { %2064 = vmatprep.subr.mxu0 %v2490_v0  ;;  %2099 = vmatprep.subr.mxu1 %v2490_v0 }
 0x2be   :  { %2065 = vmatpush3.msra.mxu0 %v2623_v41  ;;  %2100 = vmatpush3.msra.mxu1 %v2551_v6 }
 0x2bf   :  { %2066 = vmatprep.subr.mxu0 %v2490_v0  ;;  %2101 = vmatprep.subr.mxu1 %v2490_v0 }
 0x2c0   :  { %2067 = vmatpush3.msra.mxu0 %v2629_v42  ;;  %2102 = vmatpush3.msra.mxu1 %v2555_v8 }
 0x2c1   :  { %2068 = vmatprep.subr.mxu0 %v2490_v0  ;;  %2103 = vmatprep.subr.mxu1 %v2490_v0 }
 0x2c2   :  { %2069 = vmatpush3.msra.mxu0 %v2635_v43  ;;  %2104 = vmatpush3.msra.mxu1 %v2559_v10 }
 0x2c3   :  { %2070 = vmatprep.subr.mxu0 %v2490_v0  ;;  %2105 = vmatprep.subr.mxu1 %v2490_v0 }
 0x2c4   :  { %2071 = vmatpush3.msra.mxu0 %v2673_v44  ;;  %2106 = vmatpush3.msra.mxu1 %v2563_v12 }
 0x2c5   :  { %2072 = vmatprep.subr.mxu0 %v2490_v0  ;;  %2107 = vmatprep.subr.mxu1 %v2490_v0 }
 0x2c6   :  { %2073 = vmatpush3.msra.mxu0 %v2679_v47  ;;  %2108 = vmatpush3.msra.mxu1 %v2567_v14 }
 0x2c7   :  { %2074 = vmatprep.subr.mxu0 %v2490_v0  ;;  %2109 = vmatprep.subr.mxu1 %v2490_v0 }
 0x2c8   :  { %2075 = vmatpush3.msra.mxu0 %v2687_v50  ;;  %2110 = vmatpush3.msra.mxu1 %v2575_v20 }
 0x2c9   :  { %2076 = vmatprep.subr.mxu0 %v2490_v0  ;;  %2111 = vmatprep.subr.mxu1 %v2490_v0 }
 0x2ca   :  { %2077 = vmatpush3.msra.mxu0 %v2696_v53  ;;  %2112 = vmatpush3.msra.mxu1 %v2579_v22 }
 0x2cb   :  { %2078 = vmatprep.subr.mxu0 %v2490_v0  ;;  %2113 = vmatprep.subr.mxu1 %v2490_v0 }
 0x2cc   :  { %2079 = vmatpush3.msra.mxu0 %v2702_v56  ;;  %2114 = vmatpush3.msra.mxu1 %v2583_v24 }
 0x2cd   :  { %2080 = vmatprep.subr.mxu0 %v2490_v0  ;;  %2115 = vmatprep.subr.mxu1 %v2490_v0 }
 0x2ce   :  { %2081 = vmatpush3.msra.mxu0 %v2704_v57  ;;  %2116 = vmatpush3.msra.mxu1 %v2587_v26 }
 0x2cf   :  { %2082 = vmatprep.subr.mxu0 %v2490_v0  ;;  %2117 = vmatprep.subr.mxu1 %v2490_v0 }
 0x2d0   :  { %2083 = vmatpush3.msra.mxu0 %v2709_v60  ;;  %2118 = vmatpush3.msra.mxu1 %v2591_v28 }
 0x2d1   :  { %2084 = vmatprep.subr.mxu0 %v2490_v0  ;;  %2119 = vmatprep.subr.mxu1 %v2490_v0 }
 0x2d2   :  { %2085 = vmatpush3.msra.mxu0 %v2715_v1  ;;  %2120 = vmatpush3.msra.mxu1 %v2595_v30 }
 0x2d3   :  { %2086 = vmatprep.subr.mxu0 %v2490_v0  ;;  %2121 = vmatprep.subr.mxu1 %v2490_v0 }
 0x2d4   :  { %2087 = vmatpush3.msra.mxu0 %v2720_v7  ;;  %2122 = vmatpush3.msra.mxu1 %v2599_v32 }
 0x2d5   :  { %2088 = vmatprep.subr.mxu0 %v2490_v0  ;;  %2123 = vmatprep.subr.mxu1 %v2490_v0 }
 0x2d6   :  { %2089 = vmatpush3.msra.mxu0 %v2724_v11  ;;  %2124 = vmatpush3.msra.mxu1 %v2604_v35 }
 0x2d7   :  { %2090 = vmatprep.subr.mxu0 %v2490_v0  ;;  %2125 = vmatprep.subr.mxu1 %v2490_v0 }
 0x2d8   :  { %2091 = vmatpush3.msra.mxu0 %v2729_v15  ;;  %2092 = vmatprep.mubr.msk.f32.mxu0 %vm2491_vm0, %v2490_v0 }
 0x2d9   :  { %2126 = vmatpush3.msra.mxu1 %v2607_v37  ;;  %2127 = vmatprep.mubr.msk.f32.mxu1 %vm2491_vm0, %v2490_v0 }
 0x2da   :  { %2130 = vmatprep.subr.mxu0 %v2490_v0  ;;  %2165 = vmatprep.subr.mxu1 %v2490_v0 }
 0x379   :  { %v716_v18 = vpop.f32.mrf.mxu0  ;;  %v787_v21 = vpop.f32.mrf.mxu1 }
 0x37a   :  { %v717_v23 = vadd.f32 %v2827_v46, %v716_v18  ;;  %v791_v25 = vadd.f32 %v787_v21, %v265_v17  ;;  %v2427_v17 = vld [vmem:[#allocation7 + $0x110] sm:$0xff]  ;;  %v2428_v18 = vld [vmem:[#allocation7 + $0x108] sm:$0xff]  ;;  %v2429_v21 = vld [vmem:[#allocation7 + $0x100] sm:$0xff] }
 0x37b   :  { %v2024_v27 = vpop.f32.mrf.mxu0  ;;  %v2059_v29 = vpop.f32.mrf.mxu1 }
 0x37c   :  { %720 = vst [vmem:[%s3287_s4 + $0x10] sm:$0xff] %v717_v23  ;;  %2388 = vtanh.f32 %v791_v25  ;;  %v2430_v23 = vld [vmem:[%s3286_s3] ss:$0 sm:$0xff] }
 0x37d   :  { %v285_v25 = vadd.f32 %v2430_v23, %v2820_v38 }
 0x389   :  { %v2389_v33 = vpop.eup %2388 }
 0x38a   :  { %2093 = vmatmul.mubr.f32.vlgmr.msra.gmra.mxu0 %v2389_v33  ;;  %2128 = vmatmul.mubr.f32.vlgmr.msra.gmra.mxu1 %v2389_v33 }
 0x38b   :  { %2131 = vmatpush3.msra.mxu0 %v2612_v39  ;;  %2166 = vmatpush3.msra.mxu1 %v2543_v3  ;;  %v270_v3 = vadd.f32 %v2741_v19, %v2818_v36  ;;  %v3150_v36 = vld [vmem:[#allocation7 + $0x80] sm:$0xff] }
 0x38c   :  { %2132 = vmatprep.subr.mxu0 %v2490_v0  ;;  %2167 = vmatprep.subr.mxu1 %v2490_v0 }
 0x38d   :  { %2133 = vmatpush3.msra.mxu0 %v2617_v40  ;;  %2168 = vmatpush3.msra.mxu1 %v2548_v4 }
 0x38e   :  { %2134 = vmatprep.subr.mxu0 %v2490_v0  ;;  %2169 = vmatprep.subr.mxu1 %v2490_v0 }
 0x38f   :  { %2135 = vmatpush3.msra.mxu0 %v2623_v41  ;;  %2170 = vmatpush3.msra.mxu1 %v2551_v6 }
 0x390   :  { %2136 = vmatprep.subr.mxu0 %v2490_v0  ;;  %2171 = vmatprep.subr.mxu1 %v2490_v0 }
 0x391   :  { %2137 = vmatpush3.msra.mxu0 %v2629_v42  ;;  %2172 = vmatpush3.msra.mxu1 %v2555_v8 }
 0x392   :  { %2138 = vmatprep.subr.mxu0 %v2490_v0  ;;  %2173 = vmatprep.subr.mxu1 %v2490_v0 }
 0x393   :  { %2139 = vmatpush3.msra.mxu0 %v2635_v43  ;;  %2174 = vmatpush3.msra.mxu1 %v2559_v10 }
 0x394   :  { %2140 = vmatprep.subr.mxu0 %v2490_v0  ;;  %2175 = vmatprep.subr.mxu1 %v2490_v0 }
 0x395   :  { %2141 = vmatpush3.msra.mxu0 %v2673_v44  ;;  %2176 = vmatpush3.msra.mxu1 %v2563_v12 }
 0x396   :  { %2142 = vmatprep.subr.mxu0 %v2490_v0  ;;  %2177 = vmatprep.subr.mxu1 %v2490_v0 }
 0x397   :  { %2143 = vmatpush3.msra.mxu0 %v2679_v47  ;;  %2178 = vmatpush3.msra.mxu1 %v2567_v14 }
 0x398   :  { %2144 = vmatprep.subr.mxu0 %v2490_v0  ;;  %2179 = vmatprep.subr.mxu1 %v2490_v0 }
 0x399   :  { %2145 = vmatpush3.msra.mxu0 %v2687_v50  ;;  %2180 = vmatpush3.msra.mxu1 %v2575_v20 }
 0x39a   :  { %2146 = vmatprep.subr.mxu0 %v2490_v0  ;;  %2181 = vmatprep.subr.mxu1 %v2490_v0 }
 0x39b   :  { %2147 = vmatpush3.msra.mxu0 %v2696_v53  ;;  %2182 = vmatpush3.msra.mxu1 %v2579_v22  ;;  %v3058_v22 = vld [vmem:[#allocation7 + $0xf8] sm:$0xff] }
 0x39c   :  { %2148 = vmatprep.subr.mxu0 %v2490_v0  ;;  %2183 = vmatprep.subr.mxu1 %v2490_v0 }
 0x39d   :  { %2149 = vmatpush3.msra.mxu0 %v2702_v56  ;;  %2184 = vmatpush3.msra.mxu1 %v2583_v24  ;;  %v3064_v24 = vld [vmem:[#allocation7 + $0xf0] sm:$0xff] }
 0x39e   :  { %2150 = vmatprep.subr.mxu0 %v2490_v0  ;;  %2185 = vmatprep.subr.mxu1 %v2490_v0 }
 0x39f   :  { %2151 = vmatpush3.msra.mxu0 %v2704_v57  ;;  %2186 = vmatpush3.msra.mxu1 %v2587_v26  ;;  %v3070_v26 = vld [vmem:[#allocation7 + $0xe8] sm:$0xff] }
 0x3a0   :  { %2152 = vmatprep.subr.mxu0 %v2490_v0  ;;  %2187 = vmatprep.subr.mxu1 %v2490_v0 }
 0x3a1   :  { %2153 = vmatpush3.msra.mxu0 %v2709_v60  ;;  %2188 = vmatpush3.msra.mxu1 %v2591_v28  ;;  %v3076_v28 = vld [vmem:[#allocation7 + $0xe0] sm:$0xff] }
 0x3a2   :  { %2154 = vmatprep.subr.mxu0 %v2490_v0  ;;  %2189 = vmatprep.subr.mxu1 %v2490_v0 }
 0x3a3   :  { %2155 = vmatpush3.msra.mxu0 %v2715_v1  ;;  %2190 = vmatpush3.msra.mxu1 %v2595_v30  ;;  %v3082_v30 = vld [vmem:[#allocation7 + $0xd8] sm:$0xff] }
 0x3a4   :  { %2156 = vmatprep.subr.mxu0 %v2490_v0  ;;  %2191 = vmatprep.subr.mxu1 %v2490_v0 }
 0x3a5   :  { %2157 = vmatpush3.msra.mxu0 %v2720_v7  ;;  %2192 = vmatpush3.msra.mxu1 %v2599_v32  ;;  %v3088_v32 = vld [vmem:[#allocation7 + $0xd0] sm:$0xff] }
 0x3a6   :  { %2158 = vmatprep.subr.mxu0 %v2490_v0  ;;  %2193 = vmatprep.subr.mxu1 %v2490_v0 }
 0x3a7   :  { %2159 = vmatpush3.msra.mxu0 %v2724_v11  ;;  %2194 = vmatpush3.msra.mxu1 %v2604_v35  ;;  %v3094_v35 = vld [vmem:[#allocation7 + $0xc8] sm:$0xff] }
 0x3a8   :  { %2160 = vmatprep.subr.mxu0 %v2490_v0  ;;  %2195 = vmatprep.subr.mxu1 %v2490_v0 }
 0x3a9   :  { %2161 = vmatpush3.msra.mxu0 %v2729_v15  ;;  %2162 = vmatprep.mubr.msk.f32.mxu0 %vm2491_vm0, %v2490_v0 }
 0x3aa   :  { %2196 = vmatpush3.msra.mxu1 %v2607_v37  ;;  %2197 = vmatprep.mubr.msk.f32.mxu1 %vm2491_vm0, %v2490_v0  ;;  %v3100_v37 = vld [vmem:[#allocation7 + $0xc0] sm:$0xff] }
 0x3ab   :  { %2200 = vmatprep.subr.mxu0 %v2490_v0  ;;  %2235 = vmatprep.subr.mxu1 %v2490_v0 }
 0x44a   :  { %v859_v4 = vpop.f32.mrf.mxu0  ;;  %v930_v6 = vpop.f32.mrf.mxu1 }
 0x44b   :  { %v860_v8 = vadd.f32 %v2827_v46, %v859_v4  ;;  %v934_v10 = vadd.f32 %v930_v6, %v270_v3 }
 0x44c   :  { %v2094_v12 = vpop.f32.mrf.mxu0  ;;  %v2129_v14 = vpop.f32.mrf.mxu1 }
 0x44d   :  { %863 = vst [vmem:[%s3287_s4 + $0x18] sm:$0xff] %v860_v8  ;;  %2390 = vtanh.f32 %v934_v10 }
 0x45a   :  { %v2391_v20 = vpop.eup %2390 }
 0x45b   :  { %2163 = vmatmul.mubr.f32.vlgmr.msra.gmra.mxu0 %v2391_v20  ;;  %2198 = vmatmul.mubr.f32.vlgmr.msra.gmra.mxu1 %v2391_v20 }
 0x45c   :  { %2201 = vmatpush3.msra.mxu0 %v2612_v39  ;;  %2236 = vmatpush3.msra.mxu1 %v3058_v22  ;;  %v3106_v39 = vld [vmem:[#allocation7 + $0xb8] sm:$0xff] }
 0x45d   :  { %2202 = vmatprep.subr.mxu0 %v2490_v0  ;;  %2237 = vmatprep.subr.mxu1 %v2490_v0 }
 0x45e   :  { %2203 = vmatpush3.msra.mxu0 %v2617_v40  ;;  %2238 = vmatpush3.msra.mxu1 %v3064_v24  ;;  %v3112_v40 = vld [vmem:[#allocation7 + $0xb0] sm:$0xff] }
 0x45f   :  { %2204 = vmatprep.subr.mxu0 %v2490_v0  ;;  %2239 = vmatprep.subr.mxu1 %v2490_v0 }
 0x460   :  { %2205 = vmatpush3.msra.mxu0 %v2623_v41  ;;  %2240 = vmatpush3.msra.mxu1 %v3070_v26  ;;  %v3118_v41 = vld [vmem:[#allocation7 + $0xa8] sm:$0xff] }
 0x461   :  { %2206 = vmatprep.subr.mxu0 %v2490_v0  ;;  %2241 = vmatprep.subr.mxu1 %v2490_v0 }
 0x462   :  { %2207 = vmatpush3.msra.mxu0 %v2629_v42  ;;  %2242 = vmatpush3.msra.mxu1 %v3076_v28  ;;  %v3124_v42 = vld [vmem:[#allocation7 + $0xa0] sm:$0xff] }
 0x463   :  { %2208 = vmatprep.subr.mxu0 %v2490_v0  ;;  %2243 = vmatprep.subr.mxu1 %v2490_v0 }
 0x464   :  { %2209 = vmatpush3.msra.mxu0 %v2635_v43  ;;  %2244 = vmatpush3.msra.mxu1 %v3082_v30  ;;  %v3130_v43 = vld [vmem:[#allocation7 + $0x98] sm:$0xff] }
 0x465   :  { %2210 = vmatprep.subr.mxu0 %v2490_v0  ;;  %2245 = vmatprep.subr.mxu1 %v2490_v0 }
 0x466   :  { %2211 = vmatpush3.msra.mxu0 %v2673_v44  ;;  %2246 = vmatpush3.msra.mxu1 %v3088_v32  ;;  %v3136_v44 = vld [vmem:[#allocation7 + $0x90] sm:$0xff] }
 0x467   :  { %2212 = vmatprep.subr.mxu0 %v2490_v0  ;;  %2247 = vmatprep.subr.mxu1 %v2490_v0 }
 0x468   :  { %2213 = vmatpush3.msra.mxu0 %v2679_v47  ;;  %2248 = vmatpush3.msra.mxu1 %v3094_v35 }
 0x469   :  { %2214 = vmatprep.subr.mxu0 %v2490_v0  ;;  %2249 = vmatprep.subr.mxu1 %v2490_v0 }
 0x46a   :  { %2215 = vmatpush3.msra.mxu0 %v2687_v50  ;;  %2250 = vmatpush3.msra.mxu1 %v3100_v37 }
 0x46b   :  { %2216 = vmatprep.subr.mxu0 %v2490_v0  ;;  %2251 = vmatprep.subr.mxu1 %v2490_v0 }
 0x46c   :  { %2217 = vmatpush3.msra.mxu0 %v2696_v53  ;;  %2252 = vmatpush3.msra.mxu1 %v3106_v39 }
 0x46d   :  { %2218 = vmatprep.subr.mxu0 %v2490_v0  ;;  %2253 = vmatprep.subr.mxu1 %v2490_v0 }
 0x46e   :  { %2219 = vmatpush3.msra.mxu0 %v2702_v56  ;;  %2254 = vmatpush3.msra.mxu1 %v3112_v40 }
 0x46f   :  { %2220 = vmatprep.subr.mxu0 %v2490_v0  ;;  %2255 = vmatprep.subr.mxu1 %v2490_v0 }
 0x470   :  { %2221 = vmatpush3.msra.mxu0 %v2704_v57  ;;  %2256 = vmatpush3.msra.mxu1 %v3118_v41 }
 0x471   :  { %2222 = vmatprep.subr.mxu0 %v2490_v0  ;;  %2257 = vmatprep.subr.mxu1 %v2490_v0 }
 0x472   :  { %2223 = vmatpush3.msra.mxu0 %v2709_v60  ;;  %2258 = vmatpush3.msra.mxu1 %v3124_v42 }
 0x473   :  { %2224 = vmatprep.subr.mxu0 %v2490_v0  ;;  %2259 = vmatprep.subr.mxu1 %v2490_v0 }
 0x474   :  { %2225 = vmatpush3.msra.mxu0 %v2715_v1  ;;  %2260 = vmatpush3.msra.mxu1 %v3130_v43 }
 0x475   :  { %2226 = vmatprep.subr.mxu0 %v2490_v0  ;;  %2261 = vmatprep.subr.mxu1 %v2490_v0 }
 0x476   :  { %2227 = vmatpush3.msra.mxu0 %v2720_v7  ;;  %2262 = vmatpush3.msra.mxu1 %v3136_v44 }
 0x477   :  { %2228 = vmatprep.subr.mxu0 %v2490_v0  ;;  %2263 = vmatprep.subr.mxu1 %v2490_v0 }
 0x478   :  { %2229 = vmatpush3.msra.mxu0 %v2724_v11  ;;  %2264 = vmatpush3.msra.mxu1 %v3142_v31 }
 0x479   :  { %2230 = vmatprep.subr.mxu0 %v2490_v0  ;;  %2265 = vmatprep.subr.mxu1 %v2490_v0 }
 0x47a   :  { %2231 = vmatpush3.msra.mxu0 %v2729_v15  ;;  %2232 = vmatprep.mubr.msk.f32.mxu0 %vm2491_vm0, %v2490_v0 }
 0x47b   :  { %2266 = vmatpush3.msra.mxu1 %v3150_v36  ;;  %2267 = vmatprep.mubr.msk.f32.mxu1 %vm2491_vm0, %v2490_v0 }
 0x47c   :  { %2270 = vmatprep.subr.mxu0 %v2490_v0  ;;  %2305 = vmatprep.subr.mxu1 %v2490_v0 }
 0x51b   :  { %v1002_v49 = vpop.f32.mrf.mxu0  ;;  %v1073_v51 = vpop.f32.mrf.mxu1 }
 0x51c   :  { %v1003_v52 = vadd.f32 %v2827_v46, %v1002_v49  ;;  %v1077_v54 = vadd.f32 %v1073_v51, %v275_v48 }
 0x51d   :  { %v2164_v55 = vpop.f32.mrf.mxu0  ;;  %v2199_v58 = vpop.f32.mrf.mxu1 }
 0x51e   :  { %1006 = vst [vmem:[%s3287_s4 + $0x20] sm:$0xff] %v1003_v52  ;;  %2392 = vtanh.f32 %v1077_v54 }
 0x52b   :  { %v2393_v59 = vpop.eup %2392 }
 0x52c   :  { %2233 = vmatmul.mubr.f32.vlgmr.msra.gmra.mxu0 %v2393_v59  ;;  %2268 = vmatmul.mubr.f32.vlgmr.msra.gmra.mxu1 %v2393_v59 }
 0x52d   :  { %2271 = vmatpush3.msra.mxu0 %v3163_v61  ;;  %2306 = vmatpush3.msra.mxu1 %v3058_v22 }
 0x52e   :  { %2272 = vmatprep.subr.mxu0 %v2490_v0  ;;  %2307 = vmatprep.subr.mxu1 %v2490_v0 }
 0x52f   :  { %2273 = vmatpush3.msra.mxu0 %v3169_v34  ;;  %2308 = vmatpush3.msra.mxu1 %v3064_v24 }
 0x530   :  { %2274 = vmatprep.subr.mxu0 %v2490_v0  ;;  %2309 = vmatprep.subr.mxu1 %v2490_v0 }
 0x531   :  { %2275 = vmatpush3.msra.mxu0 %v3175_v62  ;;  %2310 = vmatpush3.msra.mxu1 %v3070_v26 }
 0x532   :  { %2276 = vmatprep.subr.mxu0 %v2490_v0  ;;  %2311 = vmatprep.subr.mxu1 %v2490_v0 }
 0x533   :  { %2277 = vmatpush3.msra.mxu0 %v3181_v63  ;;  %2312 = vmatpush3.msra.mxu1 %v3076_v28 }
 0x534   :  { %2278 = vmatprep.subr.mxu0 %v2490_v0  ;;  %2313 = vmatprep.subr.mxu1 %v2490_v0 }
 0x535   :  { %2279 = vmatpush3.msra.mxu0 %v3187_v2  ;;  %2314 = vmatpush3.msra.mxu1 %v3082_v30 }
 0x536   :  { %2280 = vmatprep.subr.mxu0 %v2490_v0  ;;  %2315 = vmatprep.subr.mxu1 %v2490_v0 }
 0x537   :  { %2281 = vmatpush3.msra.mxu0 %v3193_v5  ;;  %2316 = vmatpush3.msra.mxu1 %v3088_v32 }
 0x538   :  { %2282 = vmatprep.subr.mxu0 %v2490_v0  ;;  %2317 = vmatprep.subr.mxu1 %v2490_v0 }
 0x539   :  { %2283 = vmatpush3.msra.mxu0 %v2679_v47  ;;  %2318 = vmatpush3.msra.mxu1 %v3094_v35  ;;  %v280_v47 = vadd.f32 %v2741_v19, %v2822_v45  ;;  %v2422_v19 = vld [vmem:[#allocation7 + $0x138] sm:$0xff]  ;;  %v2423_v45 = vld [vmem:[#allocation7 + $0x130] sm:$0xff] }
 0x53a   :  { %2284 = vmatprep.subr.mxu0 %v2490_v0  ;;  %2319 = vmatprep.subr.mxu1 %v2490_v0 }
 0x53b   :  { %2285 = vmatpush3.msra.mxu0 %v2687_v50  ;;  %2320 = vmatpush3.msra.mxu1 %v3100_v37 }
 0x53c   :  { %2286 = vmatprep.subr.mxu0 %v2490_v0  ;;  %2321 = vmatprep.subr.mxu1 %v2490_v0 }
 0x53d   :  { %2287 = vmatpush3.msra.mxu0 %v2696_v53  ;;  %2322 = vmatpush3.msra.mxu1 %v3106_v39 }
 0x53e   :  { %2288 = vmatprep.subr.mxu0 %v2490_v0  ;;  %2323 = vmatprep.subr.mxu1 %v2490_v0 }
 0x53f   :  { %2289 = vmatpush3.msra.mxu0 %v2702_v56  ;;  %2324 = vmatpush3.msra.mxu1 %v3112_v40 }
 0x540   :  { %2290 = vmatprep.subr.mxu0 %v2490_v0  ;;  %2325 = vmatprep.subr.mxu1 %v2490_v0 }
 0x541   :  { %2291 = vmatpush3.msra.mxu0 %v2704_v57  ;;  %2326 = vmatpush3.msra.mxu1 %v3118_v41 }
 0x542   :  { %2292 = vmatprep.subr.mxu0 %v2490_v0  ;;  %2327 = vmatprep.subr.mxu1 %v2490_v0 }
 0x543   :  { %2293 = vmatpush3.msra.mxu0 %v2709_v60  ;;  %2328 = vmatpush3.msra.mxu1 %v3124_v42 }
 0x544   :  { %2294 = vmatprep.subr.mxu0 %v2490_v0  ;;  %2329 = vmatprep.subr.mxu1 %v2490_v0 }
 0x545   :  { %2295 = vmatpush3.msra.mxu0 %v2715_v1  ;;  %2330 = vmatpush3.msra.mxu1 %v3130_v43 }
 0x546   :  { %2296 = vmatprep.subr.mxu0 %v2490_v0  ;;  %2331 = vmatprep.subr.mxu1 %v2490_v0 }
 0x547   :  { %2297 = vmatpush3.msra.mxu0 %v2720_v7  ;;  %2332 = vmatpush3.msra.mxu1 %v3136_v44 }
 0x548   :  { %2298 = vmatprep.subr.mxu0 %v2490_v0  ;;  %2333 = vmatprep.subr.mxu1 %v2490_v0 }
 0x549   :  { %2299 = vmatpush3.msra.mxu0 %v2724_v11  ;;  %2334 = vmatpush3.msra.mxu1 %v3142_v31  ;;  %v2420_v11 = vld [vmem:[#allocation7 + $0x148] sm:$0xff] }
 0x54a   :  { %2300 = vmatprep.subr.mxu0 %v2490_v0  ;;  %2335 = vmatprep.subr.mxu1 %v2490_v0 }
 0x54b   :  { %2301 = vmatpush3.msra.mxu0 %v2729_v15  ;;  %2302 = vmatprep.mubr.msk.f32.mxu0 %vm2491_vm0, %v2490_v0  ;;  %v2421_v15 = vld [vmem:[#allocation7 + $0x140] sm:$0xff] }
 0x54c   :  { %2336 = vmatpush3.msra.mxu1 %v3150_v36  ;;  %2337 = vmatprep.mubr.msk.f32.mxu1 %vm2491_vm0, %v2490_v0 }
 0x54d   :  { %2340 = vmatprep.subr.mxu0 %v2490_v0 }
 0x5ec   :  { %v1145_v50 = vpop.f32.mrf.mxu0  ;;  %v1216_v53 = vpop.f32.mrf.mxu1 }
 0x5ed   :  { %v1146_v56 = vadd.f32 %v2827_v46, %v1145_v50  ;;  %v1220_v57 = vadd.f32 %v1216_v53, %v280_v47 }
 0x5ee   :  { %v2234_v60 = vpop.f32.mrf.mxu0  ;;  %v2269_v1 = vpop.f32.mrf.mxu1 }
 0x5ef   :  { %1149 = vst [vmem:[%s3287_s4 + $0x28] sm:$0xff] %v1146_v56  ;;  %2394 = vtanh.f32 %v1220_v57 }
 0x5fc   :  { %v2395_v7 = vpop.eup %2394 }
 0x5fd   :  { %2303 = vmatmul.mubr.f32.vlgmr.msra.gmra.mxu0 %v2395_v7  ;;  %2338 = vmatmul.mubr.f32.vlgmr.msra.gmra.mxu1 %v2395_v7 }
 0x5fe   :  { %2341 = vmatpush3.msra.mxu0 %v3163_v61  ;;  %2372 = vmatprep.mubr.msk.f32.mxu0 %vm2491_vm0, %v2490_v0 }
 0x5ff   :  { %2342 = vmatprep.subr.mxu0 %v2490_v0 }
 0x600   :  { %2343 = vmatpush3.msra.mxu0 %v3169_v34 }
 0x601   :  { %2344 = vmatprep.subr.mxu0 %v2490_v0 }
 0x602   :  { %2345 = vmatpush3.msra.mxu0 %v3175_v62 }
 0x603   :  { %2346 = vmatprep.subr.mxu0 %v2490_v0 }
 0x604   :  { %2347 = vmatpush3.msra.mxu0 %v3181_v63 }
 0x605   :  { %2348 = vmatprep.subr.mxu0 %v2490_v0 }
 0x606   :  { %2349 = vmatpush3.msra.mxu0 %v3187_v2 }
 0x607   :  { %2350 = vmatprep.subr.mxu0 %v2490_v0 }
 0x608   :  { %2351 = vmatpush3.msra.mxu0 %v3193_v5 }
 0x609   :  { %2352 = vmatprep.subr.mxu0 %v2490_v0 }
 0x60a   :  { %2353 = vmatpush3.msra.mxu0 %v2420_v11 }
 0x60b   :  { %2354 = vmatprep.subr.mxu0 %v2490_v0 }
 0x60c   :  { %2355 = vmatpush3.msra.mxu0 %v2421_v15 }
 0x60d   :  { %2356 = vmatprep.subr.mxu0 %v2490_v0 }
 0x60e   :  { %2357 = vmatpush3.msra.mxu0 %v2422_v19 }
 0x60f   :  { %2358 = vmatprep.subr.mxu0 %v2490_v0 }
 0x610   :  { %2359 = vmatpush3.msra.mxu0 %v2423_v45 }
 0x611   :  { %2360 = vmatprep.subr.mxu0 %v2490_v0 }
 0x612   :  { %2361 = vmatpush3.msra.mxu0 %v2424_v9 }
 0x613   :  { %2362 = vmatprep.subr.mxu0 %v2490_v0 }
 0x614   :  { %2363 = vmatpush3.msra.mxu0 %v2425_v13 }
 0x615   :  { %2364 = vmatprep.subr.mxu0 %v2490_v0 }
 0x616   :  { %2365 = vmatpush3.msra.mxu0 %v2426_v16 }
 0x617   :  { %2366 = vmatprep.subr.mxu0 %v2490_v0 }
 0x618   :  { %2367 = vmatpush3.msra.mxu0 %v2427_v17 }
 0x619   :  { %2368 = vmatprep.subr.mxu0 %v2490_v0 }
 0x61a   :  { %2369 = vmatpush3.msra.mxu0 %v2428_v18 }
 0x61b   :  { %2370 = vmatprep.subr.mxu0 %v2490_v0 }
 0x61c   :  { %2371 = vmatpush3.msra.mxu0 %v2429_v21 }
 0x6bd   :  { %v1288_v27 = vpop.f32.mrf.mxu0  ;;  %v1359_v29 = vpop.f32.mrf.mxu1 }
 0x6be   :  { %v1289_v33 = vadd.f32 %v2827_v46, %v1288_v27  ;;  %v1363_v3 = vadd.f32 %v1359_v29, %v285_v25 }
 0x6bf   :  { %v2304_v4 = vpop.f32.mrf.mxu0  ;;  %v2339_v6 = vpop.f32.mrf.mxu1 }
 0x6c0   :  { %1292 = vst [vmem:[%s3287_s4 + $0x30] sm:$0xff] %v1289_v33  ;;  %2396 = vtanh.f32 %v1363_v3 }
 0x6cd   :  { %v2397_v0 = vpop.eup %2396 }
 0x6ce   :  { %2373 = vmatmul.mubr.f32.vlgmr.msra.gmra.mxu0 %v2397_v0 }
 0x78e   :  { %v1431_v8 = vpop.f32.mrf.mxu0 }
 0x78f   :  { %v1432_v10 = vadd.f32 %v2827_v46, %v1431_v8 }
 0x790   :  { %v2374_v12 = vpop.f32.mrf.mxu0 }
 0x791   :  { %1435 = vst [vmem:[%s3287_s4 + $0x38] sm:$0xff] %v1432_v10 }
 0x792   :  { %1440 = vsyncpa [#allocation6], 1 }
 0x793   :  { %1441 = vsyncpa [#allocation8], 1 }

</bundles_post_ra>
